<compile_context>
chip_gen: v5e
topology: v5e:2x2
jax: 0.10.0
libtpu: 0.0.40
codegen_flags: <defaults>
</compile_context>

<pallas_src>
import math
from functools import partial

import jax
import jax.numpy as jnp
from jax.experimental import pallas as pl
from jax.experimental.pallas import tpu as pltpu

_BN_EPS = 1e-5


def _pick_vmem_limit():
    # Generation-aware scoped-VMEM budget: v7x has 64 MiB per TensorCore,
    # v5e/v6e have 128 MiB.  Leave headroom for double-buffered blocks.
    try:
        if jax.devices()[0].platform == "tpu":
            cap = pltpu.get_tpu_info().vmem_capacity_bytes
            return int(max(32 * 1024 * 1024, min(96 * 1024 * 1024, cap * 5 // 8)))
    except Exception:
        pass
    return 40 * 1024 * 1024


_VMEM_LIMIT = _pick_vmem_limit()


# ---------- fused 3x3 conv (pad=1) + folded-BN + ReLU (+ optional 2x2 maxpool) ----------
def _conv3x3_bn_relu_kernel(x_ref, w_ref, s_ref, b_ref, o_ref, *, pool, pad_out):
    # x_ref: (1, H+2, W+2, Cin) bf16 — halo already included
    # w_ref: (3, 3*Cin, TCout)  bf16 — row dy, (dx, cin) fused along K
    # s_ref, b_ref: (1, TCout)  f32  — folded eval-mode BatchNorm scale / bias
    # o_ref: (1, Ho(+2), Wo(+2), TCout) bf16
    Hp, Wp, Cin = x_ref.shape[1], x_ref.shape[2], x_ref.shape[3]
    H, W = Hp - 2, Wp - 2
    TC = o_ref.shape[-1]

    x = x_ref[0]                                        # (Hp, Wp, Cin) bf16
    acc = jnp.zeros((H * W, TC), jnp.float32)
    for dy in range(3):                                 # 3 dots, K = 3*Cin
        rows = x[dy:dy + H]                             # (H, Wp, Cin)
        patch = jnp.concatenate(
            [rows[:, 0:W], rows[:, 1:W + 1], rows[:, 2:W + 2]], axis=-1)
        acc = acc + jnp.dot(patch.reshape(H * W, 3 * Cin), w_ref[dy],
                            preferred_element_type=jnp.float32)

    y = jnp.maximum(acc * s_ref[...] + b_ref[...], 0.0)  # BN + ReLU (f32)
    y = y.reshape(H, W, TC)

    if pool:                                             # fused 2x2 / stride-2 maxpool
        Ho, Wo = H // 2, W // 2
        y = jnp.max(y.reshape(H, Wo, 2, TC), axis=2)     # pool along W
        y = jnp.max(y.reshape(Ho, 2, Wo, TC), axis=1)    # pool along H
    else:
        Ho, Wo = H, W

    y = y.astype(o_ref.dtype)
    if pad_out:                                          # emit halo for the next conv
        o_ref[...] = jnp.zeros(o_ref.shape, o_ref.dtype)
        o_ref[0, 1:Ho + 1, 1:Wo + 1, :] = y
    else:
        o_ref[0] = y


def conv3x3_bn_relu(x_pad, w, scale, bias, *, pool, pad_out):
    # x_pad: (N, H+2, W+2, Cin) bf16   w: (3, 3*Cin, Cout) bf16
    # scale/bias: (1, Cout) f32
    N, Hp, Wp, Cin = x_pad.shape
    H, W = Hp - 2, Wp - 2
    Cout = w.shape[-1]
    Ho, Wo = (H // 2, W // 2) if pool else (H, W)
    out_h, out_w = (Ho + 2, Wo + 2) if pad_out else (Ho, Wo)

    tc = 256 if Cout % 256 == 0 else Cout     # lane-dense Cout tiles for 256/512
    nj = Cout // tc

    kernel = partial(_conv3x3_bn_relu_kernel, pool=pool, pad_out=pad_out)
    return pl.pallas_call(
        kernel,
        out_shape=jax.ShapeDtypeStruct((N, out_h, out_w, Cout), jnp.bfloat16),
        grid=(N, nj),
        in_specs=[
            pl.BlockSpec((1, Hp, Wp, Cin), lambda n, j: (n, 0, 0, 0)),   # resident over j
            pl.BlockSpec((3, 3 * Cin, tc), lambda n, j: (0, 0, j)),
            pl.BlockSpec((1, tc), lambda n, j: (0, j)),
            pl.BlockSpec((1, tc), lambda n, j: (0, j)),
        ],
        out_specs=pl.BlockSpec((1, out_h, out_w, tc), lambda n, j: (n, 0, 0, j)),
        compiler_params=pltpu.CompilerParams(
            dimension_semantics=("parallel", "parallel"),
            vmem_limit_bytes=_VMEM_LIMIT),
    )(x_pad, w, scale, bias)


# ---------- 1x1 conv (64 -> 1) + ReLU, written as a lane-dense channel reduction ----------
def _conv1x1_relu_kernel(x_ref, w_ref, b_ref, o_ref):
    # x_ref: (1, H, W, C) bf16   w_ref: (1, C) f32   b_ref: (1, 1) f32
    # o_ref: (1, H, W) f32 — lane-dense along W, no last-dim-1 masked stores
    x = x_ref[0].astype(jnp.float32)                       # (H, W, C)
    y = jnp.sum(x * w_ref[...], axis=-1) + b_ref[...]      # (H, W) + (1,1)
    o_ref[0] = jnp.maximum(y, 0.0)                         # output_layer has ReLU in spec


def conv1x1_relu(x, w, b):
    N, H, W, C = x.shape
    return pl.pallas_call(
        _conv1x1_relu_kernel,
        out_shape=jax.ShapeDtypeStruct((N, H, W), jnp.float32),
        grid=(N,),
        in_specs=[
            pl.BlockSpec((1, H, W, C), lambda n: (n, 0, 0, 0)),
            pl.BlockSpec((1, C), lambda n: (0, 0)),
            pl.BlockSpec((1, 1), lambda n: (0, 0)),
        ],
        out_specs=pl.BlockSpec((1, H, W), lambda n: (n, 0, 0)),
        compiler_params=pltpu.CompilerParams(
            dimension_semantics=("parallel",),
            vmem_limit_bytes=_VMEM_LIMIT),
    )(x, w, b)


# ---------- deterministic parameter construction ----------
def _init_conv_bn(key, cin, cout, pool, pad_out):
    ks = jax.random.split(key, 6)
    w = jax.random.normal(ks[0], (3, 3, cin, cout), jnp.float32) / math.sqrt(9 * cin)
    b = 0.01 * jax.random.normal(ks[1], (cout,), jnp.float32)          # conv bias
    gamma = 1.0 + 0.1 * jax.random.normal(ks[2], (cout,), jnp.float32)
    beta = 0.1 * jax.random.normal(ks[3], (cout,), jnp.float32)
    r_mean = 0.05 * jax.random.normal(ks[4], (cout,), jnp.float32)
    r_var = 1.0 + 0.1 * jnp.abs(jax.random.normal(ks[5], (cout,), jnp.float32))
    scale = gamma / jnp.sqrt(r_var + _BN_EPS)
    bias = (b - r_mean) * scale + beta          # fold conv-bias + eval-mode BN
    return {
        "w": w.reshape(3, 3 * cin, cout).astype(jnp.bfloat16),  # (dy, dx*cin, cout)
        "scale": scale.reshape(1, cout),
        "bias": bias.reshape(1, cout),
        "pool": pool,
        "pad_out": pad_out,
    }


def init_params(key):
    frontend_feat = [64, 64, "M", 128, 128, "M", 256, 256, 256, "M", 512, 512, 512]
    backend_feat = [512, 512, 512, 256, 128, 64]    # dilation=False -> d_rate=1
    cfg = frontend_feat + backend_feat

    specs = []                                      # (cin, cout, pool-after)
    cin = 3
    for v in cfg:
        if v == "M":
            specs[-1] = (specs[-1][0], specs[-1][1], True)
        else:
            specs.append((cin, v, False))
            cin = v

    layers = []
    for i, (ci, co, pool) in enumerate(specs):
        key, sub = jax.random.split(key)
        pad_out = i < len(specs) - 1                # last conv feeds the 1x1 layer
        layers.append(_init_conv_bn(sub, ci, co, pool, pad_out))

    k1, k2 = jax.random.split(key)
    out_w = (jax.random.normal(k1, (cin,), jnp.float32) / math.sqrt(cin)).reshape(1, cin)
    out_b = (0.01 * jax.random.normal(k2, (1,), jnp.float32)).reshape(1, 1)
    return {"layers": layers, "out_w": out_w, "out_b": out_b}


# ---------- forward (mirrors baseline_bn.forward) ----------
def baseline_bn_forward(x_nchw, params):
    # NCHW -> NHWC, bf16, and add the 1-pixel halo once (only 3 input channels);
    # every subsequent conv emits its own halo, so no per-layer pad round trips.
    x = jnp.transpose(x_nchw, (0, 2, 3, 1)).astype(jnp.bfloat16)
    x = jnp.pad(x, ((0, 0), (1, 1), (1, 1), (0, 0)))
    for layer in params["layers"]:
        x = conv3x3_bn_relu(x, layer["w"], layer["scale"], layer["bias"],
                            pool=layer["pool"], pad_out=layer["pad_out"])
    y = conv1x1_relu(x, params["out_w"], params["out_b"])   # (N, H, W) f32
    return y[:, None, :, :]                                  # -> NCHW with C=1


if __name__ == "__main__":
    key = jax.random.PRNGKey(0)
    kp, kx = jax.random.split(key)
    params = init_params(kp)
    x = jax.random.normal(kx, (2, 3, 16, 16), jnp.float32)   # NCHW, like PyTorch
    y = jax.block_until_ready(baseline_bn_forward(x, params))
    # 3 fused maxpools: 16 -> 2 spatial; output channels = 1
    assert y.shape == (2, 1, 2, 2), y.shape
    assert bool(jnp.all(jnp.isfinite(y)))
    print("KERNEL_OK")
</pallas_src>

<mosaic_0001>
module attributes {stable_mosaic.version = 11 : i64} {
  func.func @_conv3x3_bn_relu_kernel(%arg0: i32, %arg1: i32, %arg2: memref<1x18x18x3xbf16, #tpu.memory_space<vmem>>, %arg3: memref<3x9x64xbf16, #tpu.memory_space<vmem>>, %arg4: memref<1x64xf32, #tpu.memory_space<vmem>>, %arg5: memref<1x64xf32, #tpu.memory_space<vmem>>, %arg6: memref<1x18x18x64xbf16, #tpu.memory_space<vmem>>) attributes {dimension_semantics = [#tpu.dimension_semantics<parallel>, #tpu.dimension_semantics<parallel>], iteration_bounds = array<i64: 2, 1>, scalar_prefetch = 0 : i64, scratch_operands = 0 : i64, tpu.core_type = #tpu.core_type<tc>, window_params = [{transform_indices = @transform_0, window_bounds = array<i64: 1, 18, 18, 3>}, {transform_indices = @transform_1, window_bounds = array<i64: 3, 9, 64>}, {transform_indices = @transform_2, window_bounds = array<i64: 1, 64>}, {transform_indices = @transform_3, window_bounds = array<i64: 1, 64>}, {transform_indices = @transform_4, window_bounds = array<i64: 1, 18, 18, 64>}]} {
    %c0 = arith.constant 0 : index
    %c0_0 = arith.constant 0 : index
    %c0_1 = arith.constant 0 : index
    %c0_2 = arith.constant 0 : index
    %0 = vector.load %arg2[%c0, %c0_0, %c0_1, %c0_2] : memref<1x18x18x3xbf16, #tpu.memory_space<vmem>>, vector<1x18x18x3xbf16>
    %1 = vector.shape_cast %0 : vector<1x18x18x3xbf16> to vector<18x18x3xbf16>
    %cst = arith.constant 0.000000e+00 : f32
    %2 = vector.broadcast %cst : f32 to vector<256x64xf32>
    %3 = vector.extract_strided_slice %1 {offsets = [0, 0, 0], sizes = [16, 18, 3], strides = [1, 1, 1]} : vector<18x18x3xbf16> to vector<16x18x3xbf16>
    %4 = vector.extract_strided_slice %3 {offsets = [0, 0, 0], sizes = [16, 16, 3], strides = [1, 1, 1]} : vector<16x18x3xbf16> to vector<16x16x3xbf16>
    %5 = vector.extract_strided_slice %3 {offsets = [0, 1, 0], sizes = [16, 16, 3], strides = [1, 1, 1]} : vector<16x18x3xbf16> to vector<16x16x3xbf16>
    %6 = vector.extract_strided_slice %3 {offsets = [0, 2, 0], sizes = [16, 16, 3], strides = [1, 1, 1]} : vector<16x18x3xbf16> to vector<16x16x3xbf16>
    %7 = tpu.concatenate %4, %5, %6 in 2 : vector<16x16x3xbf16>, vector<16x16x3xbf16>, vector<16x16x3xbf16> -> vector<16x16x9xbf16>
    %8 = vector.shape_cast %7 : vector<16x16x9xbf16> to vector<256x9xbf16>
    %c0_3 = arith.constant 0 : index
    %c0_4 = arith.constant 0 : index
    %c0_5 = arith.constant 0 : index
    %9 = vector.load %arg3[%c0_3, %c0_4, %c0_5] : memref<3x9x64xbf16, #tpu.memory_space<vmem>>, vector<1x9x64xbf16>
    %10 = vector.shape_cast %9 : vector<1x9x64xbf16> to vector<9x64xbf16>
    %cst_6 = arith.constant dense<0.000000e+00> : vector<256x64xf32>
    %11 = tpu.matmul %8, %10, %cst_6 {dimension_numbers = #tpu.dot_dimension_numbers<[1], [0], [0], [1], [0, 0, 1, 1], [], []>} : vector<256x9xbf16>, vector<9x64xbf16>, vector<256x64xf32> -> vector<256x64xf32>
    %12 = arith.addf %2, %11 : vector<256x64xf32>
    %13 = vector.extract_strided_slice %1 {offsets = [1, 0, 0], sizes = [16, 18, 3], strides = [1, 1, 1]} : vector<18x18x3xbf16> to vector<16x18x3xbf16>
    %14 = vector.extract_strided_slice %13 {offsets = [0, 0, 0], sizes = [16, 16, 3], strides = [1, 1, 1]} : vector<16x18x3xbf16> to vector<16x16x3xbf16>
    %15 = vector.extract_strided_slice %13 {offsets = [0, 1, 0], sizes = [16, 16, 3], strides = [1, 1, 1]} : vector<16x18x3xbf16> to vector<16x16x3xbf16>
    %16 = vector.extract_strided_slice %13 {offsets = [0, 2, 0], sizes = [16, 16, 3], strides = [1, 1, 1]} : vector<16x18x3xbf16> to vector<16x16x3xbf16>
    %17 = tpu.concatenate %14, %15, %16 in 2 : vector<16x16x3xbf16>, vector<16x16x3xbf16>, vector<16x16x3xbf16> -> vector<16x16x9xbf16>
    %18 = vector.shape_cast %17 : vector<16x16x9xbf16> to vector<256x9xbf16>
    %c1 = arith.constant 1 : index
    %c0_7 = arith.constant 0 : index
    %c0_8 = arith.constant 0 : index
    %19 = vector.load %arg3[%c1, %c0_7, %c0_8] : memref<3x9x64xbf16, #tpu.memory_space<vmem>>, vector<1x9x64xbf16>
    %20 = vector.shape_cast %19 : vector<1x9x64xbf16> to vector<9x64xbf16>
    %cst_9 = arith.constant dense<0.000000e+00> : vector<256x64xf32>
    %21 = tpu.matmul %18, %20, %cst_9 {dimension_numbers = #tpu.dot_dimension_numbers<[1], [0], [0], [1], [0, 0, 1, 1], [], []>} : vector<256x9xbf16>, vector<9x64xbf16>, vector<256x64xf32> -> vector<256x64xf32>
    %22 = arith.addf %12, %21 : vector<256x64xf32>
    %23 = vector.extract_strided_slice %1 {offsets = [2, 0, 0], sizes = [16, 18, 3], strides = [1, 1, 1]} : vector<18x18x3xbf16> to vector<16x18x3xbf16>
    %24 = vector.extract_strided_slice %23 {offsets = [0, 0, 0], sizes = [16, 16, 3], strides = [1, 1, 1]} : vector<16x18x3xbf16> to vector<16x16x3xbf16>
    %25 = vector.extract_strided_slice %23 {offsets = [0, 1, 0], sizes = [16, 16, 3], strides = [1, 1, 1]} : vector<16x18x3xbf16> to vector<16x16x3xbf16>
    %26 = vector.extract_strided_slice %23 {offsets = [0, 2, 0], sizes = [16, 16, 3], strides = [1, 1, 1]} : vector<16x18x3xbf16> to vector<16x16x3xbf16>
    %27 = tpu.concatenate %24, %25, %26 in 2 : vector<16x16x3xbf16>, vector<16x16x3xbf16>, vector<16x16x3xbf16> -> vector<16x16x9xbf16>
    %28 = vector.shape_cast %27 : vector<16x16x9xbf16> to vector<256x9xbf16>
    %c2 = arith.constant 2 : index
    %c0_10 = arith.constant 0 : index
    %c0_11 = arith.constant 0 : index
    %29 = vector.load %arg3[%c2, %c0_10, %c0_11] : memref<3x9x64xbf16, #tpu.memory_space<vmem>>, vector<1x9x64xbf16>
    %30 = vector.shape_cast %29 : vector<1x9x64xbf16> to vector<9x64xbf16>
    %cst_12 = arith.constant dense<0.000000e+00> : vector<256x64xf32>
    %31 = tpu.matmul %28, %30, %cst_12 {dimension_numbers = #tpu.dot_dimension_numbers<[1], [0], [0], [1], [0, 0, 1, 1], [], []>} : vector<256x9xbf16>, vector<9x64xbf16>, vector<256x64xf32> -> vector<256x64xf32>
    %32 = arith.addf %22, %31 : vector<256x64xf32>
    %c0_13 = arith.constant 0 : index
    %c0_14 = arith.constant 0 : index
    %33 = vector.load %arg4[%c0_13, %c0_14] : memref<1x64xf32, #tpu.memory_space<vmem>>, vector<1x64xf32>
    %34 = vector.broadcast %33 : vector<1x64xf32> to vector<256x64xf32>
    %35 = arith.mulf %32, %34 : vector<256x64xf32>
    %c0_15 = arith.constant 0 : index
    %c0_16 = arith.constant 0 : index
    %36 = vector.load %arg5[%c0_15, %c0_16] : memref<1x64xf32, #tpu.memory_space<vmem>>, vector<1x64xf32>
    %37 = vector.broadcast %36 : vector<1x64xf32> to vector<256x64xf32>
    %38 = arith.addf %35, %37 : vector<256x64xf32>
    %cst_17 = arith.constant 0.000000e+00 : f32
    %39 = vector.broadcast %cst_17 : f32 to vector<256x64xf32>
    %40 = arith.maximumf %38, %39 : vector<256x64xf32>
    %41 = vector.shape_cast %40 : vector<256x64xf32> to vector<16x16x64xf32>
    %42 = arith.truncf %41 : vector<16x16x64xf32> to vector<16x16x64xbf16>
    %cst_18 = arith.constant 0.000000e+00 : bf16
    %43 = vector.broadcast %cst_18 : bf16 to vector<1x18x18x64xbf16>
    %c0_19 = arith.constant 0 : index
    %c0_20 = arith.constant 0 : index
    %c0_21 = arith.constant 0 : index
    %c0_22 = arith.constant 0 : index
    %44 = vector.load %arg6[%c0_19, %c0_20, %c0_21, %c0_22] : memref<1x18x18x64xbf16, #tpu.memory_space<vmem>>, vector<1x18x18x64xbf16>
    tpu.vector_store %arg6[%c0_19, %c0_20, %c0_21, %c0_22], %43 {strides = array<i32>} : memref<1x18x18x64xbf16, #tpu.memory_space<vmem>>, vector<1x18x18x64xbf16>,
    %c0_23 = arith.constant 0 : index
    %c1_24 = arith.constant 1 : index
    %c1_25 = arith.constant 1 : index
    %c0_26 = arith.constant 0 : index
    %45 = vector.load %arg6[%c0_23, %c1_24, %c1_25, %c0_26] : memref<1x18x18x64xbf16, #tpu.memory_space<vmem>>, vector<1x16x16x64xbf16>
    %46 = vector.shape_cast %45 : vector<1x16x16x64xbf16> to vector<16x16x64xbf16>
    %47 = vector.shape_cast %42 : vector<16x16x64xbf16> to vector<1x16x16x64xbf16>
    tpu.vector_store %arg6[%c0_23, %c1_24, %c1_25, %c0_26], %47 {strides = array<i32>} : memref<1x18x18x64xbf16, #tpu.memory_space<vmem>>, vector<1x16x16x64xbf16>,
    return
  }
  func.func @transform_0(%arg0: i32, %arg1: i32) -> (i32, i32, i32, i32) {
    %c0_i32 = arith.constant 0 : i32
    %c0_i32_0 = arith.constant 0 : i32
    %c0_i32_1 = arith.constant 0 : i32
    %c0_i32_2 = arith.constant 0 : i32
    return %arg0, %c0_i32, %c0_i32_0, %c0_i32_1 : i32, i32, i32, i32
  }
  func.func @transform_1(%arg0: i32, %arg1: i32) -> (i32, i32, i32) {
    %c0_i32 = arith.constant 0 : i32
    %c0_i32_0 = arith.constant 0 : i32
    %c0_i32_1 = arith.constant 0 : i32
    return %c0_i32, %c0_i32_0, %arg1 : i32, i32, i32
  }
  func.func @transform_2(%arg0: i32, %arg1: i32) -> (i32, i32) {
    %c0_i32 = arith.constant 0 : i32
    %c0_i32_0 = arith.constant 0 : i32
    return %c0_i32, %arg1 : i32, i32
  }
  func.func @transform_3(%arg0: i32, %arg1: i32) -> (i32, i32) {
    %c0_i32 = arith.constant 0 : i32
    %c0_i32_0 = arith.constant 0 : i32
    return %c0_i32, %arg1 : i32, i32
  }
  func.func @transform_4(%arg0: i32, %arg1: i32) -> (i32, i32, i32, i32) {
    %c0_i32 = arith.constant 0 : i32
    %c0_i32_0 = arith.constant 0 : i32
    %c0_i32_1 = arith.constant 0 : i32
    return %arg0, %c0_i32, %c0_i32_0, %arg1 : i32, i32, i32, i32
  }
}

</mosaic_0001>

<bundles_post_ra>
// kernel: tpu_custom_call.1
= control target key start
LH: loop header
LB: loop body
LE: loop exit
PB: predicated region body
PF: predicated region fallthrough
CT: control target
= control target key end

     0   :  { %s2340_s15 = smov 0   ;;  %s2342_s16 = smov 0   ;;  %s3256_s0 = inlined_call_operand.vmem [shape: bf16[2,18,18,3], index: 0, kind: input, shape index: {}]   ;;  %s3257_s1 = inlined_call_operand.vmem [shape: bf16[3,9,64], index: 1, kind: input, shape index: {}]   ;;  %s3258_s2 = inlined_call_operand.vmem [shape: f32[1,64], index: 2, kind: input, shape index: {}]   ;;  %s3259_s3 = inlined_call_operand.vmem [shape: f32[1,64], index: 3, kind: input, shape index: {}]   ;;  %s3260_s4 = inlined_call_operand.vmem [shape: bf16[2,18,18,64], index: 4, kind: output, shape index: {}]  }
   0x1   :  { %s2344_s17 = smov 0  }
   0x2 LB: > { %s26_s18 = sadd.s32 1, %s2305_s16  ;;  %p2009_p0 = scmp.ge.s32.totalorder %s2309_s17, 1  ;;  %s2309_s17 = sphi %s2344_s17, %s14_s17   ;;  %s2305_s16 = sphi %s2342_s16, %s3268_s16   ;;  %s2301_s15 = sphi %s2340_s15, %s3267_s15  }
   0x3   : > { %p28_p1 = scmp.ge.s32.totalorder %s26_s18, 2  ;;  %p201_p2 = scmp.lt.s32.totalorder %s2309_s17, 3 }
   0x5   : > { %s3270_s18 = smov (%p28_p1, %s26_s18), 0  ;;  %p202_p3 = pnand %p2009_p0, %p201_p2 }
   0x6   : > { %p240_p4 = scmp.lt.s32.totalorder (!%p202_p3), %s2301_s15, 1  ;;  %s2311_s23 = smov (!%p202_p3), 6  }
   0x7   : > { %205 = sbr.rel (%p202_p3) target bundleno = 489 (0x1e9), region = 36  ;;  %s2312_s24 = smov (!%p202_p3), 3  }
   0xc   : > { %s3272_s15 = smov (!%p240_p4, %s2301_s15), 1  ;;  %vm671_vm0 = vcmask 1046528   ;;  %vm446_vm1 = vsmask.f32 7424  ;;  %vm892_vm2 = vcmask 1043456   ;;  %vm893_vm3 = vcmask 1044480  }
   0xd   : > { %s2254_s19 = smul.u32 216, %s3272_s15  ;;  %vm752_vm4 = vcmask 23552   ;;  %vm785_vm5 = vcmask 48128   ;;  %vm859_vm6 = vcmask 72704   ;;  %vm1388_vm7 = vcmask 519168  }
   0xe   : > { %vm1391_vm8 = vcmask 516096   ;;  %vm1769_vm9 = vsmask.f32 7938  ;;  %vm1444_vm11 = vsmask.f32 256 }
   0xf   : > { %s2366_s22 = scalar_lea.vmem %s3256_s0, %s2254_s19  ;;  %s2694_s13 = scalar_lea.vmem %s3260_s4, %s2254_s19  ;;  %vm2855_vm10 = vmand %vm1388_vm7, %vm1769_vm9  ;;  %vm1445_vm12 = vsmask.f32 4368 }
  0x10   : > { %v2369_v0 = vld [vmem:[%s2366_s22 + $0x18] sm:$0xff]  ;;  %v272_v1 = vld [vmem:[%s2366_s22 + $0x20] sm:$0x1]  ;;  %v305_v4 = vld [vmem:[%s2366_s22 + $0xa4] sm:$0x1] }
  0x11   : > { %v2373_v2 = vld [vmem:[%s2366_s22 + $0x9c] sm:$0xff]  ;;  %v416_v3 = vunpack.c.l.b16 %v272_v1  ;;  %v472_v5 = vshrl.u32 %v2369_v0, 16  ;;  %v474_v6 = vshll.u32 %v2369_v0, 16  ;;  %v427_v7 = vunpack.c.l.b16 %v305_v4  ;;  %v266_v11 = vld [vmem:[%s2366_s22 + $0x8] sm:$0x1]  ;;  %v2397_v38 = vld [vmem:[%s2366_s22 + $0xc] sm:$0xff] }
  0x12   : > { %v678_v9 = vrot.slane %v2369_v0, 1  ;;  %v606_v10 = vshll.u32 %v2373_v2, 16  ;;  %v604_v17 = vshrl.u32 %v2373_v2, 16  ;;  %v269_v18 = vld [vmem:[%s2366_s22 + $0x14] sm:$0x1]  ;;  %v414_v19 = vunpack.c.l.b16 %v266_v11  ;;  %v2389_v28 = vld [vmem:[%s2366_s22] sm:$0xff]  ;;  %vm2887_vm13 = vmor %vm1444_vm11, %vm1445_vm12 }
  0x13   : > { %v432_v8 = vpack.c.b16 %v416_v3, %v416_v3  ;;  %v476_v12 = vrot.slane %v474_v6, 1  ;;  %v443_v13 = vpack.c.b16 %v427_v7, %v427_v7  ;;  %v711_v25 = vrot.slane %v2373_v2, 1  ;;  %v275_v32 = vld [vmem:[%s2366_s22 + $0x2c] sm:$0x1]  ;;  %v308_v33 = vld [vmem:[%s2366_s22 + $0xb0] sm:$0x1]  ;;  %vm2899_vm14 = vmand %vm1391_vm8, %vm1444_vm11 }
  0x14   : > { %v608_v22 = vrot.slane %v606_v10, 1  ;;  %v415_v27 = vunpack.c.l.b16 %v269_v18  ;;  %v430_v29 = vpack.c.b16 %v414_v19, %v414_v19  ;;  %v448_v34 = vshrl.u32 %v2389_v28, 16  ;;  %v2401_v44 = vld [vmem:[%s2366_s22 + $0xa8] sm:$0xff]  ;;  %v311_v57 = vld [vmem:[%s2366_s22 + $0xbc] sm:$0x1]  ;;  %v2422_v4 = vld [vmem:[%s2366_s22 + $0xb4] sm:$0xff] }
  0x15   : > { %v679_v14 = vrot.slane %v432_v8, 1  ;;  %v479_v15 = vshll.u32 %v432_v8, 16  ;;  %v477_v16 = vor.u32 %v476_v12, %v472_v5  ;;  %v611_v23 = vshll.u32 %v443_v13, 16  ;;  %v2410_v54 = vld [vmem:[%s2366_s22 + $0x24] sm:$0xff]  ;;  %v278_v61 = vld [vmem:[%s2366_s22 + $0x38] sm:$0x1] }
  0x16   : > { %v712_v26 = vrot.slane %v443_v13, 1  ;;  %v609_v30 = vor.u32 %v608_v22, %v604_v17  ;;  %v450_v35 = vshll.u32 %v2389_v28, 16  ;;  %v455_v36 = vshll.u32 %v430_v29, 16  ;;  %v2429_v12 = vld [vmem:[%s2366_s22 + $0x30] sm:$0xff] }
  0x17   : > { %v680_v20 = vsel %vm671_vm0, %v678_v9, %v679_v14  ;;  %v481_v21 = vrot.slane %v479_v15, 1  ;;  %v613_v31 = vrot.slane %v611_v23, 1  ;;  %v431_v39 = vpack.c.b16 %v415_v27, %v415_v27 }
  0x18   : > { %724 = vrot.lane.b32.xlu1 %v680_v20, %s2311_s23  ;;  %v713_v37 = vsel %vm671_vm0, %v711_v25, %v712_v26  ;;  %v452_v40 = vrot.slane %v450_v35, 1  ;;  %v457_v41 = vrot.slane %v455_v36, 1  ;;  %v417_v43 = vunpack.c.l.b16 %v275_v32  ;;  %v281_v20 = vld [vmem:[%s2366_s22 + $0x44] sm:$0x1]  ;;  %v2442_v32 = vld [vmem:[%s2366_s22 + $0x3c] sm:$0xff] }
  0x19   : > { %v482_v24 = vsel %vm446_vm1, %v477_v16, %v481_v21  ;;  %v614_v42 = vsel %vm446_vm1, %v609_v30, %v613_v31  ;;  %v428_v45 = vunpack.c.l.b16 %v308_v33  ;;  %v460_v47 = vshrl.u32 %v2397_v38, 16 }
  0x1a   : > { %643 = vrot.lane.b32.xlu0 %v482_v24, %s2312_s24  ;;  %v453_v46 = vor.u32 %v452_v40, %v448_v34  ;;  %v462_v48 = vshll.u32 %v2397_v38, 16  ;;  %v675_v49 = vrot.slane %v2397_v38, 1  ;;  %v676_v50 = vrot.slane %v431_v39, 1 }
  0x1b   : > { %v467_v51 = vshll.u32 %v431_v39, 16  ;;  %v672_v52 = vrot.slane %v2389_v28, 1  ;;  %v673_v53 = vrot.slane %v430_v29, 1  ;;  %v433_v58 = vpack.c.b16 %v417_v43, %v417_v43 }
  0x1c   : > { %v458_v55 = vsel %vm446_vm1, %v453_v46, %v457_v41  ;;  %v464_v56 = vrot.slane %v462_v48, 1  ;;  %v2414_v59 = vpack.c.b16 %v428_v45, %v428_v45  ;;  %v618_v60 = vshll.u32 %v2401_v44, 16 }
  0x1d   : > { %639 = vrot.lane.b32.xlu2 %v458_v55, %s2312_s24  ;;  %v469_v63 = vrot.slane %v467_v51, 1  ;;  %v486_v1 = vshll.u32 %v2410_v54, 16  ;;  %v677_v3 = vsel %vm671_vm0, %v675_v49, %v676_v50  ;;  %v429_v5 = vunpack.c.l.b16 %v311_v57 }
  0x1e   : > { %v465_v62 = vor.u32 %v464_v56, %v460_v47  ;;  %v674_v6 = vsel %vm671_vm0, %v672_v52, %v673_v53  ;;  %v681_v7 = vrot.slane %v2410_v54, 1  ;;  %v616_v8 = vshrl.u32 %v2401_v44, 16  ;;  %v314_v53 = vld [vmem:[%s2366_s22 + $0xc8] sm:$0x1] }
  0x1f   : > { %v682_v9 = vrot.slane %v433_v58, 1  ;;  %v620_v10 = vrot.slane %v618_v60, 1  ;;  %v623_v11 = vshll.u32 %v2414_v59, 16  ;;  %v418_v13 = vunpack.c.l.b16 %v278_v61 }
  0x20   : > { %746 = vrot.lane.b32.xlu1 %v713_v37, %s2311_s23  ;;  %v470_v14 = vsel %vm446_vm1, %v465_v62, %v469_v63  ;;  %v484_v15 = vshrl.u32 %v2410_v54, 16  ;;  %v488_v16 = vrot.slane %v486_v1, 1  ;;  %v491_v17 = vshll.u32 %v433_v58, 16 }
  0x21   : > { %v445_v18 = vpack.c.b16 %v429_v5, %v429_v5  ;;  %v630_v19 = vshll.u32 %v2422_v4, 16  ;;  %v621_v21 = vor.u32 %v620_v10, %v616_v8  ;;  %v625_v22 = vrot.slane %v623_v11, 1  ;;  %v284_v8 = vld [vmem:[%s2366_s22 + $0x50] sm:$0x1] }
  0x22   : > { %665 = vrot.lane.b32.xlu0 %v614_v42, %s2312_s24  ;;  %v434_v23 = vpack.c.b16 %v418_v13, %v418_v13  ;;  %v498_v24 = vshll.u32 %v2429_v12, 16  ;;  %v683_v25 = vsel %vm671_vm0, %v681_v7, %v682_v9  ;;  %v489_v26 = vor.u32 %v488_v16, %v484_v15  ;;  %v2472_v10 = vld [vmem:[%s2366_s22 + $0x90] sm:$0xff] }
  0x23   : > { %v493_v27 = vrot.slane %v491_v17, 1  ;;  %v628_v29 = vshrl.u32 %v2422_v4, 16  ;;  %v632_v30 = vrot.slane %v630_v19, 1  ;;  %v635_v31 = vshll.u32 %v445_v18, 16 }
  0x24   : > { %v419_v33 = vunpack.c.l.b16 %v281_v20  ;;  %v626_v34 = vsel %vm446_vm1, %v621_v21, %v625_v22  ;;  %v496_v35 = vshrl.u32 %v2429_v12, 16  ;;  %v500_v36 = vrot.slane %v498_v24, 1  ;;  %v2481_v22 = vld [vmem:[%s2366_s22 + $0x48] sm:$0xff] }
  0x25   : > { %641 = vrot.lane.b32.xlu2 %v470_v14, %s2312_s24  ;;  %v503_v37 = vshll.u32 %v434_v23, 16  ;;  %v494_v39 = vsel %vm446_vm1, %v489_v26, %v493_v27  ;;  %v633_v40 = vor.u32 %v632_v30, %v628_v29  ;;  %v637_v41 = vrot.slane %v635_v31, 1  ;;  %v287_v27 = vld [vmem:[%s2366_s22 + $0x5c] sm:$0x1] }
  0x26   : > { %v435_v42 = vpack.c.b16 %v419_v33, %v419_v33  ;;  %v510_v43 = vshll.u32 %v2442_v32, 16  ;;  %v501_v45 = vor.u32 %v500_v36, %v496_v35  ;;  %v714_v47 = vrot.slane %v2401_v44, 1 }
  0x27   : > { %v505_v46 = vrot.slane %v503_v37, 1  ;;  %v715_v48 = vrot.slane %v2414_v59, 1  ;;  %v638_v49 = vsel %vm446_vm1, %v633_v40, %v637_v41  ;;  %v508_v50 = vshrl.u32 %v2442_v32, 16  ;;  %v2461_v59 = vld [vmem:[%s2366_s22 + $0xc0] sm:$0xff]  ;;  %v2491_v37 = vld [vmem:[%s2366_s22 + $0x54] sm:$0xff] }
  0x28   : > { %722 = vrot.lane.b32.xlu1 %v677_v3, %s2311_s23  ;;  %v512_v51 = vrot.slane %v510_v43, 1  ;;  %v515_v52 = vshll.u32 %v435_v42, 16  ;;  %v826_v60 = vunpack.c.l.b16 %v314_v53  ;;  %v717_v61 = vrot.slane %v2422_v4, 1  ;;  %v302_v3 = vld [vmem:[%s2366_s22 + $0x98] sm:$0x1] }
  0x29   : > { %v506_v55 = vsel %vm446_vm1, %v501_v45, %v505_v46  ;;  %v716_v56 = vsel %vm671_vm0, %v714_v47, %v715_v48  ;;  %v718_v62 = vrot.slane %v445_v18, 1  ;;  %v684_v63 = vrot.slane %v2429_v12, 1 }
  0x2a   : > { %720 = vrot.lane.b32.xlu0 %v674_v6, %s2311_s23  ;;  %v513_v57 = vor.u32 %v512_v51, %v508_v50  ;;  %v517_v58 = vrot.slane %v515_v52, 1  ;;  %v685_v1 = vrot.slane %v434_v23, 1  ;;  %v831_v5 = vshll.u32 %v2461_v59, 16 }
  0x2b   : > { %v827_v7 = vpack.c.b16 %v826_v60, %v826_v60  ;;  %v719_v9 = vsel %vm671_vm0, %v717_v61, %v718_v62  ;;  %v426_v11 = vunpack.c.l.b16 %v302_v3  ;;  %v829_v14 = vshrl.u32 %v2461_v59, 16  ;;  %v290_v61 = vld [vmem:[%s2366_s22 + $0x68] sm:$0x1] }
  0x2c   : > { %v518_v6 = vsel %vm446_vm1, %v513_v57, %v517_v58  ;;  %v686_v13 = vsel %vm671_vm0, %v684_v63, %v685_v1  ;;  %v833_v15 = vrot.slane %v831_v5, 1  ;;  %v842_v17 = vrot.slane %v2461_v59, 1 }
  0x2d   : > { %645 = vrot.lane.b32.xlu2 %v494_v39, %s2312_s24  ;;  %v836_v16 = vshll.u32 %v827_v7, 16  ;;  %v843_v18 = vrot.slane %v827_v7, 1  ;;  %v420_v19 = vunpack.c.l.b16 %v284_v8  ;;  %v687_v20 = vrot.slane %v2442_v32, 1 }
  0x2e   : > { %v688_v21 = vrot.slane %v435_v42, 1  ;;  %v442_v23 = vpack.c.b16 %v426_v11, %v426_v11  ;;  %v594_v24 = vshll.u32 %v2472_v10, 16  ;;  %v522_v29 = vshll.u32 %v2481_v22, 16  ;;  %v2513_v11 = vld [vmem:[%s2366_s22 + $0x60] sm:$0xff] }
  0x2f   : > { %v838_v26 = vrot.slane %v836_v16, 1  ;;  %v844_v30 = vsel %vm671_vm0, %v842_v17, %v843_v18  ;;  %v436_v31 = vpack.c.b16 %v420_v19, %v420_v19  ;;  %v421_v39 = vunpack.c.l.b16 %v287_v27  ;;  %v293_v18 = vld [vmem:[%s2366_s22 + $0x74] sm:$0x1]  ;;  %v2524_v19 = vld [vmem:[%s2366_s22 + $0x6c] sm:$0xff] }
  0x30   : > { %726 = vrot.lane.b32.xlu1 %v683_v25, %s2311_s23  ;;  %v834_v25 = vor.u32 %v833_v15, %v829_v14  ;;  %v689_v33 = vsel %vm671_vm0, %v687_v20, %v688_v21  ;;  %v596_v35 = vrot.slane %v594_v24, 1  ;;  %v599_v36 = vshll.u32 %v442_v23, 16  ;;  %v2130_v21 = vld [vmem:[%s3257_s1 + $0x10] sm:$0xf] }
  0x31   : > { %v520_v41 = vshrl.u32 %v2481_v22, 16  ;;  %v524_v42 = vrot.slane %v522_v29, 1  ;;  %v527_v43 = vshll.u32 %v436_v31, 16  ;;  %v690_v45 = vrot.slane %v2481_v22, 1 }
  0x32   : > { %667 = vrot.lane.b32.xlu0 %v626_v34, %s2312_s24  ;;  %v592_v34 = vshrl.u32 %v2472_v10, 16  ;;  %v839_v40 = vsel %vm446_vm1, %v834_v25, %v838_v26  ;;  %v691_v46 = vrot.slane %v436_v31, 1  ;;  %v601_v48 = vrot.slane %v599_v36, 1 }
  0x33   : > { %v534_v50 = vshll.u32 %v2491_v37, 16  ;;  %v525_v51 = vor.u32 %v524_v42, %v520_v41  ;;  %v529_v52 = vrot.slane %v527_v43, 1  ;;  %v693_v62 = vrot.slane %v2491_v37, 1  ;;  %v2084_v41 = vld [vmem:[%s3257_s1 + $0x8] sm:$0xf] }
  0x34   : > { %v597_v47 = vor.u32 %v596_v35, %v592_v34  ;;  %v692_v53 = vsel %vm671_vm0, %v690_v45, %v691_v46  ;;  %v422_v5 = vunpack.c.l.b16 %v290_v61  ;;  %v709_v7 = vrot.slane %v442_v23, 1  ;;  %v2250_v23 = vld [vmem:[%s3257_s1 + $0x10] sm:$0x10]  ;;  %v2249_v42 = vld [vmem:[%s3257_s1 + $0x8] sm:$0x10] }
  0x35   : > { %748 = vrot.lane.b32.xlu2 %v716_v56, %s2311_s23  ;;  %v532_v56 = vshrl.u32 %v2491_v37, 16  ;;  %v536_v57 = vrot.slane %v534_v50, 1  ;;  %v530_v60 = vsel %vm446_vm1, %v525_v51, %v529_v52  ;;  %v696_v15 = vrot.slane %v2513_v11, 1  ;;  %v296_v52 = vld [vmem:[%s2366_s22 + $0x80] sm:$0x1] }
  0x36   : > { %v423_v20 = vunpack.c.l.b16 %v293_v18  ;;  %v2313_v24 = vmov 65535   ;;  %v2131_v26 = vor.u32 %v2250_v23, %v2130_v21  ;;  %v2085_v43 = vor.u32 %v2249_v42, %v2084_v41 }
  0x37   : > { %v537_v1 = vor.u32 %v536_v57, %v532_v56  ;;  %v894_v25 = vsel %vm892_vm2, 4294967295, %v2313_v24  ;;  %v546_v45 = vshll.u32 %v2513_v11, 16  ;;  %v2248_v56 = vld [vmem:[%s3257_s1] sm:$0x10]  ;;  %v2556_v57 = vld [vmem:[%s2366_s22 + $0x78] sm:$0xff] }
  0x38   : > { %669 = vrot.lane.b32.xlu1 %v638_v49, %s2312_s24  ;;  %v437_v49 = vpack.c.b16 %v421_v39, %v421_v39  ;;  %v439_v27 = vpack.c.b16 %v423_v20, %v423_v20  ;;  %v895_v29 = vsel %vm893_vm3, %v894_v25, 0  ;;  %v299_v20 = vld [vmem:[%s2366_s22 + $0x8c] sm:$0x1]  ;;  %v2571_v24 = vld [vmem:[%s2366_s22 + $0x84] sm:$0xff] }
  0x39   : > { %v2533_v31 = vand.u32 %v2131_v26, %v895_v29  ;;  %v897_v46 = vand.u32 %v2085_v43, %v895_v29  ;;  %v425_v21 = vunpack.c.l.b16 %v299_v20 }
  0x3a   : > { %647 = vrot.lane.b32.xlu0 %v506_v55, %s2312_s24  ;;  %v602_v55 = vsel %vm446_vm1, %v597_v47, %v601_v48  ;;  %v539_v58 = vshll.u32 %v437_v49, 16  ;;  %v694_v63 = vrot.slane %v437_v49, 1  ;;  %v563_v34 = vshll.u32 %v439_v27, 16 }
  0x3b   : > { %1138 = vmatpush.bf16.msra.mxu2 %v2533_v31  ;;  %v544_v47 = vshrl.u32 %v2513_v11, 16  ;;  %v548_v48 = vrot.slane %v546_v45, 1  ;;  %2251 = vmatpush.bf16.msra.mxu3 %v897_v46  ;;  %v441_v25 = vpack.c.b16 %v425_v21, %v425_v21 }
  0x3c   : > { %v541_v3 = vrot.slane %v539_v58, 1  ;;  %v695_v8 = vsel %vm671_vm0, %v693_v62, %v694_v63  ;;  %v565_v36 = vrot.slane %v563_v34, 1  ;;  %906 = vmatpush.bf16.msra.mxu0 %v897_v46  ;;  %v424_v58 = vunpack.c.l.b16 %v296_v52 }
  0x3d   : > { %728 = vrot.lane.b32.xlu2 %v686_v13, %s2311_s23  ;;  %v438_v13 = vpack.c.b16 %v422_v5, %v422_v5  ;;  %v549_v50 = vor.u32 %v548_v48, %v544_v47  ;;  %v570_v62 = vshll.u32 %v2556_v57, 16 }
  0x3e   : > { %v440_v61 = vpack.c.b16 %v424_v58, %v424_v58 }
  0x3f   : > { %v697_v16 = vrot.slane %v438_v13, 1  ;;  %v551_v49 = vshll.u32 %v438_v13, 16 }
  0x40   : > { %649 = vrot.lane.b32.xlu1 %v518_v6, %s2312_s24  ;;  %v708_v6 = vrot.slane %v2472_v10, 1  ;;  %v575_v5 = vshll.u32 %v440_v61, 16 }
  0x41   : > { %v698_v17 = vsel %vm671_vm0, %v696_v15, %v697_v16  ;;  %v553_v51 = vrot.slane %v551_v49, 1  ;;  %v699_v16 = vrot.slane %v2524_v19, 1  ;;  %v580_v49 = vshrl.u32 %v2571_v24, 16 }
  0x42   : > { %750 = vrot.lane.b32.xlu0 %v719_v9, %s2311_s23  ;;  %v542_v9 = vsel %vm446_vm1, %v537_v1, %v541_v3  ;;  %v710_v14 = vsel %vm671_vm0, %v708_v6, %v709_v7  ;;  %v568_v1 = vshrl.u32 %v2556_v57, 16  ;;  %v572_v3 = vrot.slane %v570_v62, 1  ;;  %v2616_v62 = vld [vmem:[%s2366_s22 + $0xcc] sm:$0xff] }
  0x43   : > { %v577_v7 = vrot.slane %v575_v5, 1 }
  0x44   : > { %v573_v6 = vor.u32 %v572_v3, %v568_v1  ;;  %v1098_v3 = vshll.u32 %v2616_v62, 16 }
  0x45   : > { %840 = vrot.lane.b32.xlu2 %v839_v40, %s2312_s24 }
  0x46   : > { %v578_v13 = vsel %vm446_vm1, %v573_v6, %v577_v7  ;;  %v1096_v6 = vshrl.u32 %v2616_v62, 16  ;;  %v1100_v7 = vrot.slane %v1098_v3, 1 }
  0x48   : > { %845 = vrot.lane.b32.xlu1 %v844_v30, %s2311_s23  ;;  %v558_v30 = vshll.u32 %v2524_v19, 16 }
  0x4a   : > { %730 = vrot.lane.b32.xlu0 %v689_v33, %s2311_s23  ;;  %v556_v33 = vshrl.u32 %v2524_v19, 16  ;;  %v560_v35 = vrot.slane %v558_v30, 1  ;;  %v705_v30 = vrot.slane %v2571_v24, 1 }
  0x4c   : > { %v561_v39 = vor.u32 %v560_v35, %v556_v33 }
  0x4d   : > { %651 = vrot.lane.b32.xlu2 %v530_v60, %s2312_s24 }
  0x4e   : > { %v566_v40 = vsel %vm446_vm1, %v561_v39, %v565_v36 }
  0x50   : > { %732 = vrot.lane.b32.xlu1 %v692_v53, %s2311_s23  ;;  %v554_v53 = vsel %vm446_vm1, %v549_v50, %v553_v51  ;;  %v587_v51 = vshll.u32 %v441_v25, 16 }
  0x52   : > { %663 = vrot.lane.b32.xlu0 %v602_v55, %s2312_s24  ;;  %v2104_v55 = vld [vmem:[%s3257_s1] sm:$0xf] }
  0x53   : > { %v2105_v60 = vor.u32 %v2248_v56, %v2104_v55  ;;  %v589_v56 = vrot.slane %v587_v51, 1 }
  0x55   : > { %744 = vrot.lane.b32.xlu2 %v710_v14, %s2311_s23  ;;  %v996_v63 = vand.u32 %v2105_v60, %v895_v29 }
  0x57   : > { %2252 = vmatpush.bf16.msrb.mxu3 %v996_v63  ;;  %1005 = vmatpush.bf16.msra.mxu1 %v996_v63 }
  0x58   : > { %734 = vrot.lane.b32.xlu1 %v695_v8, %s2311_s23  ;;  %v702_v8 = vrot.slane %v2556_v57, 1 }
  0x5a   : > { %653 = vrot.lane.b32.xlu0 %v542_v9, %s2312_s24  ;;  %v703_v9 = vrot.slane %v440_v61, 1  ;;  %v317_v61 = vld [vmem:[%s2366_s22 + $0xd4] sm:$0x1] }
  0x5b   : > { %v1093_v63 = vunpack.c.l.b16 %v317_v61 }
  0x5c   : > { %v704_v14 = vsel %vm671_vm0, %v702_v8, %v703_v9 }
  0x5d   : > { %655 = vrot.lane.b32.xlu2 %v554_v53, %s2312_s24  ;;  %v1094_v1 = vpack.c.b16 %v1093_v63, %v1093_v63  ;;  %v2795_v63 = vld [vmem:[%s3259_s3] ss:$0 sm:$0xff] }
  0x5f   : > { %v1103_v8 = vshll.u32 %v1094_v1, 16 }
  0x60   : > { %657 = vrot.lane.b32.xlu1 %v566_v40, %s2312_s24 }
  0x62   : > { %736 = vrot.lane.b32.xlu0 %v698_v17, %s2311_s23  ;;  %v700_v17 = vrot.slane %v439_v27, 1  ;;  %v706_v27 = vrot.slane %v441_v25, 1 }
  0x64   : > { %v701_v18 = vsel %vm671_vm0, %v699_v16, %v700_v17  ;;  %v707_v35 = vsel %vm671_vm0, %v705_v30, %v706_v27 }
  0x65   : > { %738 = vrot.lane.b32.xlu2 %v701_v18, %s2311_s23 }
  0x68   : > { %740 = vrot.lane.b32.xlu1 %v704_v14, %s2311_s23  ;;  %v1101_v14 = vor.u32 %v1100_v7, %v1096_v6 }
  0x6a   : > { %659 = vrot.lane.b32.xlu0 %v578_v13, %s2312_s24 }
  0x72   : > { %742 = vrot.lane.b32.xlu0 %v707_v35, %s2311_s23  ;;  %v1110_v35 = vrot.slane %v1094_v1, 1 }
  0x77   : > { %v640_v15 = vpop.permute.xlu2 %639 }
  0x78   : > { %v754_v46 = vsel %vm752_vm4, %v2389_v28, %v640_v15  ;;  %v1105_v15 = vrot.slane %v1103_v8, 1 }
  0x7a   : > { %v1106_v17 = vsel %vm446_vm1, %v1101_v14, %v1105_v15 }
  0x7b   : > { %1107 = vrot.lane.b32.xlu1 %v1106_v17, %s2312_s24 }
  0x7f   : > { %v642_v34 = vpop.permute.xlu2 %641 }
  0x80   : > { %v756_v41 = vsel %vm752_vm4, %v2397_v38, %v642_v34  ;;  %v582_v38 = vshll.u32 %v2571_v24, 16 }
  0x82   : > { %v584_v50 = vrot.slane %v582_v38, 1 }
  0x84   : > { %v585_v55 = vor.u32 %v584_v50, %v580_v49 }
  0x86   : > { %v590_v60 = vsel %vm446_vm1, %v585_v55, %v589_v56 }
  0x87   : > { %v646_v42 = vpop.permute.xlu2 %645  ;;  %661 = vrot.lane.b32.xlu2 %v590_v60, %s2312_s24  ;;  %v2782_v60 = vld [vmem:[%s3258_s2] ss:$0 sm:$0xff] }
  0x88   : > { %v760_v48 = vsel %vm752_vm4, %v2410_v54, %v646_v42 }
  0x8a   : > { %v725_v23 = vpop.permute.xlu1 %724 }
  0x8c   : > { %v644_v26 = vpop.permute.xlu0 %643 }
  0x8d   : > { %v758_v29 = vsel %vm752_vm4, %v2369_v0, %v644_v26 }
  0x8e   : > { %v2577_v33 = vsel %vm785_vm5, %v758_v29, %v725_v23 }
  0x8f   : > { %2132 = vmatmul.msk.bf16.vlgmr.msra.gmra.mxu2 %vm859_vm6, %v2577_v33  ;;  %v749_v52 = vpop.permute.xlu2 %748 }
  0x92   : > { %v747_v36 = vpop.permute.xlu1 %746 }
  0x94   : > { %v666_v39 = vpop.permute.xlu0 %665 }
  0x95   : > { %v780_v40 = vsel %vm752_vm4, %v2373_v2, %v666_v39 }
  0x96   : > { %v2586_v0 = vsel %vm785_vm5, %v780_v40, %v747_v36 }
  0x97   : > { %2098 = vmatmul.msk.bf16.vlgmr.msra.gmra.mxu3 %vm859_vm6, %v2586_v0  ;;  %v729_v13 = vpop.permute.xlu2 %728 }
  0x98   : > { %2253 = vmatpush.bf16.msra.mxu3 %v2533_v31 }
  0x9a   : > { %v723_v43 = vpop.permute.xlu1 %722 }
  0x9b   : > { %v789_v45 = vsel %vm785_vm5, %v756_v41, %v723_v43 }
  0x9c   : > { %v721_v47 = vpop.permute.xlu0 %720  ;;  %2086 = vmatmul.msk.bf16.vlgmr.msra.gmra.mxu0 %vm859_vm6, %v789_v45 }
  0x9d   : > { %v787_v2 = vsel %vm785_vm5, %v754_v46, %v721_v47 }
  0x9e   : > { %2106 = vmatmul.msk.bf16.vlgmr.msra.gmra.mxu1 %vm859_vm6, %v787_v2 }
  0x9f   : > { %v841_v23 = vpop.permute.xlu2 %840 }
  0xa0   : > { %v848_v29 = vsel %vm752_vm4, %v2461_v59, %v841_v23 }
  0xa2   : > { %v727_v31 = vpop.permute.xlu1 %726 }
  0xa3   : > { %v793_v28 = vsel %vm785_vm5, %v760_v48, %v727_v31 }
  0xa4   : > { %v668_v53 = vpop.permute.xlu0 %667  ;;  %2133 = vmatmul.msk.bf16.gmra.mxu2 %vm859_vm6, %v793_v28 }
  0xa5   : > { %v782_v54 = vsel %vm752_vm4, %v2401_v44, %v668_v53 }
  0xa6   : > { %v2608_v58 = vsel %vm785_vm5, %v782_v54, %v749_v52 }
  0xa7   : > { %2099 = vmatmul.msk.bf16.gmra.mxu3 %vm859_vm6, %v2608_v58  ;;  %v652_v34 = vpop.permute.xlu2 %651 }
  0xa8   : > { %v766_v59 = vsel %vm752_vm4, %v2481_v22, %v652_v34 }
  0xaa   : > { %v670_v5 = vpop.permute.xlu1 %669 }
  0xab   : > { %v784_v18 = vsel %vm752_vm4, %v2422_v4, %v670_v5 }
  0xac   : > { %2087 = vmatmul.msk.bf16.gmra.mxu0 %vm859_vm6, %v2577_v33  ;;  %v648_v44 = vpop.permute.xlu0 %647 }
  0xad   : > { %v762_v9 = vsel %vm752_vm4, %v2429_v12, %v648_v44 }
  0xae   : > { %2107 = vmatmul.msk.bf16.gmra.mxu1 %vm859_vm6, %v789_v45  ;;  %v795_v16 = vsel %vm785_vm5, %v762_v9, %v729_v13 }
  0xaf   : > { %v745_v42 = vpop.permute.xlu2 %744 }
  0xb2   : > { %v650_v12 = vpop.permute.xlu1 %649 }
  0xb3   : > { %v764_v25 = vsel %vm752_vm4, %v2442_v32, %v650_v12  ;;  %v1109_v32 = vrot.slane %v2616_v62, 1 }
  0xb4   : > { %2134 = vmatmul.msk.bf16.gmra.mxu2 %vm859_vm6, %v795_v16  ;;  %v751_v20 = vpop.permute.xlu0 %750 }
  0xb5   : > { %v2632_v21 = vsel %vm785_vm5, %v784_v18, %v751_v20 }
  0xb7   : > { %2100 = vmatmul.msk.bf16.gmra.mxu3 %vm859_vm6, %v2632_v21  ;;  %v656_v47 = vpop.permute.xlu2 %655 }
  0xb8   : > { %v770_v2 = vsel %vm752_vm4, %v2513_v11, %v656_v47  ;;  %v2314_v11 = vmov 0  }
  0xb9   : > { %1393 = vst.msk [vmem:[%s2694_s13 + $0xc] sm:$0xf] %vm1388_vm7, %v2314_v11 }
  0xba   : > { %v846_v30 = vpop.permute.xlu1 %845  ;;  %1389 = vst.msk [vmem:[%s2694_s13] sm:$0xf] %vm1388_vm7, %v2314_v11 }
  0xbb   : > { %v2646_v27 = vsel %vm785_vm5, %v848_v29, %v846_v30  ;;  %1390 = vst.msk [vmem:[%s2694_s13 + $0x4] sm:$0xf] %vm1388_vm7, %v2314_v11 }
  0xbc   : > { %2088 = vmatmul.msk.bf16.gmra.mxu0 %vm859_vm6, %v793_v28  ;;  %v731_v4 = vpop.permute.xlu0 %730  ;;  %1394 = vst.msk [vmem:[%s2694_s13 + $0x10] sm:$0xf] %vm1388_vm7, %v2314_v11 }
  0xbd   : > { %v797_v26 = vsel %vm785_vm5, %v764_v25, %v731_v4  ;;  %1396 = vst.msk [vmem:[%s2694_s13 + $0x18] sm:$0xf] %vm1388_vm7, %v2314_v11 }
  0xbe   : > { %2108 = vmatmul.msk.bf16.gmra.mxu1 %vm859_vm6, %v2577_v33  ;;  %v1111_v33 = vsel %vm671_vm0, %v1109_v32, %v1110_v35  ;;  %1397 = vst.msk [vmem:[%s2694_s13 + $0x1c] sm:$0xf] %vm1388_vm7, %v2314_v11 }
  0xbf   : > { %1112 = vrot.lane.b32.xlu2 %v1111_v33, %s2311_s23  ;;  %v739_v49 = vpop.permute.xlu2 %738  ;;  %1399 = vst.msk [vmem:[%s2694_s13 + $0x24] sm:$0xf] %vm1388_vm7, %v2314_v11 }
  0xc0   : > { %1400 = vst.msk [vmem:[%s2694_s13 + $0x28] sm:$0xf] %vm1388_vm7, %v2314_v11  ;;  %v2148_v29 = vld [vmem:[%s2694_s13 + $0xc] sm:$0xf] }
  0xc1   : > { %1402 = vst.msk [vmem:[%s2694_s13 + $0x30] sm:$0xf] %vm1388_vm7, %v2314_v11 }
  0xc2   : > { %v733_v36 = vpop.permute.xlu1 %732  ;;  %1403 = vst.msk [vmem:[%s2694_s13 + $0x34] sm:$0xf] %vm1388_vm7, %v2314_v11 }
  0xc3   : > { %v799_v41 = vsel %vm785_vm5, %v766_v59, %v733_v36  ;;  %1405 = vst.msk [vmem:[%s2694_s13 + $0x3c] sm:$0xf] %vm1388_vm7, %v2314_v11 }
  0xc4   : > { %2135 = vmatmul.msk.bf16.gmra.mxu2 %vm859_vm6, %v797_v26  ;;  %v664_v39 = vpop.permute.xlu0 %663  ;;  %1406 = vst.msk [vmem:[%s2694_s13 + $0x40] sm:$0xf] %vm1388_vm7, %v2314_v11 }
  0xc5   : > { %v778_v40 = vsel %vm752_vm4, %v2472_v10, %v664_v39  ;;  %1408 = vst.msk [vmem:[%s2694_s13 + $0x48] sm:$0xf] %vm1388_vm7, %v2314_v11 }
  0xc6   : > { %v2662_v43 = vsel %vm785_vm5, %v778_v40, %v745_v42  ;;  %1409 = vst.msk [vmem:[%s2694_s13 + $0x4c] sm:$0xf] %vm1388_vm7, %v2314_v11 }
  0xc7   : > { %2101 = vmatmul.msk.bf16.gmra.mxu3 %vm859_vm6, %v2646_v27  ;;  %1411 = vst.msk [vmem:[%s2694_s13 + $0x54] sm:$0xf] %vm1388_vm7, %v2314_v11 }
  0xc8   : > { %1412 = vst.msk [vmem:[%s2694_s13 + $0x58] sm:$0xf] %vm1388_vm7, %v2314_v11 }
  0xc9   : > { %1414 = vst.msk [vmem:[%s2694_s13 + $0x60] sm:$0xf] %vm1388_vm7, %v2314_v11 }
  0xca   : > { %v735_v10 = vpop.permute.xlu1 %734  ;;  %1415 = vst.msk [vmem:[%s2694_s13 + $0x64] sm:$0xf] %vm1388_vm7, %v2314_v11 }
  0xcb   : > { %1417 = vst.msk [vmem:[%s2694_s13 + $0x6c] sm:$0xf] %vm1388_vm7, %v2314_v11 }
  0xcc   : > { %2089 = vmatmul.msk.bf16.gmra.mxu0 %vm859_vm6, %v795_v16  ;;  %v654_v45 = vpop.permute.xlu0 %653  ;;  %1418 = vst.msk [vmem:[%s2694_s13 + $0x70] sm:$0xf] %vm1388_vm7, %v2314_v11 }
  0xcd   : > { %v768_v22 = vsel %vm752_vm4, %v2491_v37, %v654_v45  ;;  %1420 = vst.msk [vmem:[%s2694_s13 + $0x78] sm:$0xf] %vm1388_vm7, %v2314_v11 }
  0xce   : > { %2109 = vmatmul.msk.bf16.gmra.mxu1 %vm859_vm6, %v793_v28  ;;  %v801_v46 = vsel %vm785_vm5, %v768_v22, %v735_v10  ;;  %1421 = vst.msk [vmem:[%s2694_s13 + $0x7c] sm:$0xf] %vm1388_vm7, %v2314_v11 }
  0xcf   : > { %1423 = vst.msk [vmem:[%s2694_s13 + $0x84] sm:$0xf] %vm1388_vm7, %v2314_v11 }
  0xd0   : > { %1424 = vst.msk [vmem:[%s2694_s13 + $0x88] sm:$0xf] %vm1388_vm7, %v2314_v11 }
  0xd1   : > { %1426 = vst.msk [vmem:[%s2694_s13 + $0x90] sm:$0xf] %vm1388_vm7, %v2314_v11 }
  0xd2   : > { %v658_v38 = vpop.permute.xlu1 %657  ;;  %1427 = vst.msk [vmem:[%s2694_s13 + $0x94] sm:$0xf] %vm1388_vm7, %v2314_v11 }
  0xd3   : > { %v772_v31 = vsel %vm752_vm4, %v2524_v19, %v658_v38  ;;  %1429 = vst.msk [vmem:[%s2694_s13 + $0x9c] sm:$0xf] %vm1388_vm7, %v2314_v11 }
  0xd4   : > { %2136 = vmatmul.msk.bf16.gmra.mxu2 %vm859_vm6, %v799_v41  ;;  %v737_v48 = vpop.permute.xlu0 %736  ;;  %v2687_v50 = vsel %vm785_vm5, %v772_v31, %v739_v49  ;;  %1430 = vst.msk [vmem:[%s2694_s13 + $0xa0] sm:$0xf] %vm1388_vm7, %v2314_v11 }
  0xd5   : > { %v803_v37 = vsel %vm785_vm5, %v770_v2, %v737_v48  ;;  %1432 = vst.msk [vmem:[%s2694_s13 + $0xa8] sm:$0xf] %vm1388_vm7, %v2314_v11 }
  0xd6   : > { %1433 = vst.msk [vmem:[%s2694_s13 + $0xac] sm:$0xf] %vm1388_vm7, %v2314_v11 }
  0xd7   : > { %2118 = vmatmul.msk.bf16.vlgmr.msrb.gmra.mxu3 %vm859_vm6, %v2662_v43  ;;  %1435 = vst.msk [vmem:[%s2694_s13 + $0xb4] sm:$0xf] %vm1388_vm7, %v2314_v11 }
  0xd8   : > { %1436 = vst.msk [vmem:[%s2694_s13 + $0xb8] sm:$0xf] %vm1388_vm7, %v2314_v11 }
  0xd9   : > { %1438 = vst.msk [vmem:[%s2694_s13 + $0xc0] sm:$0xf] %vm1388_vm7, %v2314_v11 }
  0xda   : > { %v741_v28 = vpop.permute.xlu1 %740  ;;  %1439 = vst.msk [vmem:[%s2694_s13 + $0xc4] sm:$0xf] %vm1388_vm7, %v2314_v11 }
  0xdb   : > { %1441 = vst.msk [vmem:[%s2694_s13 + $0xcc] sm:$0xf] %vm1388_vm7, %v2314_v11 }
  0xdc   : > { %2090 = vmatmul.msk.bf16.gmra.mxu0 %vm859_vm6, %v797_v26  ;;  %v660_v19 = vpop.permute.xlu0 %659  ;;  %1442 = vst.msk [vmem:[%s2694_s13 + $0xd0] sm:$0xf] %vm1388_vm7, %v2314_v11 }
  0xdd   : > { %v774_v51 = vsel %vm752_vm4, %v2556_v57, %v660_v19  ;;  %1395 = vst.msk [vmem:[%s2694_s13 + $0x14] sm:$0x1] %vm1391_vm8, %v2314_v11 }
  0xde   : > { %2110 = vmatmul.msk.bf16.gmra.mxu1 %vm859_vm6, %v795_v16  ;;  %v2738_v52 = vsel %vm785_vm5, %v774_v51, %v741_v28  ;;  %1392 = vst.msk [vmem:[%s2694_s13 + $0x8] sm:$0x1] %vm1391_vm8, %v2314_v11 }
  0xdf   : > { %1398 = vst.msk [vmem:[%s2694_s13 + $0x20] sm:$0x1] %vm1391_vm8, %v2314_v11 }
  0xe0   : > { %1401 = vst.msk [vmem:[%s2694_s13 + $0x2c] sm:$0x1] %vm1391_vm8, %v2314_v11 }
  0xe1   : > { %v662_v54 = vpop.permute.xlu2 %661  ;;  %1404 = vst.msk [vmem:[%s2694_s13 + $0x38] sm:$0x1] %vm1391_vm8, %v2314_v11 }
  0xe2   : > { %v776_v1 = vsel %vm752_vm4, %v2571_v24, %v662_v54  ;;  %1407 = vst.msk [vmem:[%s2694_s13 + $0x44] sm:$0x1] %vm1391_vm8, %v2314_v11 }
  0xe3   : > { %1410 = vst.msk [vmem:[%s2694_s13 + $0x50] sm:$0x1] %vm1391_vm8, %v2314_v11 }
  0xe4   : > { %2137 = vmatmul.msk.bf16.gmra.mxu2 %vm859_vm6, %v801_v46  ;;  %v743_v3 = vpop.permute.xlu0 %742  ;;  %1413 = vst.msk [vmem:[%s2694_s13 + $0x5c] sm:$0x1] %vm1391_vm8, %v2314_v11 }
  0xe5   : > { %v2814_v7 = vsel %vm785_vm5, %v776_v1, %v743_v3  ;;  %1416 = vst.msk [vmem:[%s2694_s13 + $0x68] sm:$0x1] %vm1391_vm8, %v2314_v11 }
  0xe6   : > { %1419 = vst.msk [vmem:[%s2694_s13 + $0x74] sm:$0x1] %vm1391_vm8, %v2314_v11 }
  0xe7   : > { %2119 = vmatmul.msk.bf16.gmra.mxu3 %vm859_vm6, %v2586_v0  ;;  %1422 = vst.msk [vmem:[%s2694_s13 + $0x80] sm:$0x1] %vm1391_vm8, %v2314_v11 }
  0xe8   : > { %1425 = vst.msk [vmem:[%s2694_s13 + $0x8c] sm:$0x1] %vm1391_vm8, %v2314_v11 }
  0xe9   : > { %1428 = vst.msk [vmem:[%s2694_s13 + $0x98] sm:$0x1] %vm1391_vm8, %v2314_v11 }
  0xea   : > { %1431 = vst.msk [vmem:[%s2694_s13 + $0xa4] sm:$0x1] %vm1391_vm8, %v2314_v11 }
  0xeb   : > { %1434 = vst.msk [vmem:[%s2694_s13 + $0xb0] sm:$0x1] %vm1391_vm8, %v2314_v11 }
  0xec   : > { %2091 = vmatmul.msk.bf16.gmra.mxu0 %vm859_vm6, %v799_v41  ;;  %1437 = vst.msk [vmem:[%s2694_s13 + $0xbc] sm:$0x1] %vm1391_vm8, %v2314_v11 }
  0xed   : > { %1440 = vst.msk [vmem:[%s2694_s13 + $0xc8] sm:$0x1] %vm1391_vm8, %v2314_v11 }
  0xee   : > { %2111 = vmatmul.msk.bf16.gmra.mxu1 %vm859_vm6, %v797_v26  ;;  %1443 = vst.msk [vmem:[%s2694_s13 + $0xd4] sm:$0x1] %vm1391_vm8, %v2314_v11 }
  0xf4   : > { %2138 = vmatmul.msk.bf16.gmra.mxu2 %vm859_vm6, %v803_v37 }
  0xf7   : > { %2120 = vmatmul.msk.bf16.gmra.mxu3 %vm859_vm6, %v2608_v58 }
  0xfc   : > { %2092 = vmatmul.msk.bf16.gmra.mxu0 %vm859_vm6, %v801_v46 }
  0xfe   : > { %2112 = vmatmul.msk.bf16.gmra.mxu1 %vm859_vm6, %v799_v41 }
 0x104   : > { %2139 = vmatmul.msk.bf16.gmra.mxu2 %vm859_vm6, %v2687_v50 }
 0x107   : > { %2121 = vmatmul.msk.bf16.gmra.mxu3 %vm859_vm6, %v2632_v21 }
 0x10c   : > { %2093 = vmatmul.msk.bf16.gmra.mxu0 %vm859_vm6, %v803_v37 }
 0x10e   : > { %2113 = vmatmul.msk.bf16.gmra.mxu1 %vm859_vm6, %v801_v46 }
 0x112   : > { %v1140_v57 = vpop.f32.mrf.mxu2 }
 0x114   : > { %2140 = vmatmul.msk.bf16.gmra.mxu2 %vm859_vm6, %v2738_v52 }
 0x117   : > { %2144 = vmatmul.msk.bf16.vlgmr.msra.gmra.mxu3 %vm859_vm6, %v2608_v58 }
 0x119   : > { %v908_v53 = vpop.f32.mrf.mxu0 }
 0x11a   : > { %v2771_v55 = vpop.f32.mrf.mxu3  ;;  %v1142_v44 = vpop.f32.mrf.mxu2 }
 0x11b   : > { %v1007_v56 = vpop.f32.mrf.mxu1 }
 0x11c   : > { %v1008_v58 = vadd.f32 %v1007_v56, %v908_v53  ;;  %2094 = vmatmul.msk.bf16.gmra.mxu0 %vm859_vm6, %v2687_v50 }
 0x11e   : > { %v1220_v61 = vadd.f32 %v1140_v57, %v1008_v58  ;;  %2114 = vmatmul.msk.bf16.gmra.mxu1 %vm859_vm6, %v803_v37  ;;  %v2151_v37 = vld [vmem:[%s2694_s13 + $0x14] sm:$0x1] }
 0x120   : > { %v1256_v5 = vmul.f32 %v2782_v60, %v1220_v61 }
 0x121   : > { %v910_v6 = vpop.f32.mrf.mxu0 }
 0x122   : > { %v1292_v24 = vadd.f32 %v2795_v63, %v1256_v5  ;;  %v2820_v8 = vpop.f32.mrf.mxu3 }
 0x123   : > { %v1009_v9 = vpop.f32.mrf.mxu1 }
 0x124   : > { %v1324_v13 = vmax.f32 %v1292_v24, 0.0  ;;  %v1010_v14 = vadd.f32 %v1009_v9, %v910_v6  ;;  %2141 = vmatmul.msk.bf16.gmra.mxu2 %vm859_vm6, %v2814_v7 }
 0x126   : > { %v1356_v15 = vpack.c.bf16 %v1324_v13, %v1324_v13  ;;  %v1221_v16 = vadd.f32 %v1142_v44, %v1010_v14  ;;  %v1108_v14 = vpop.permute.xlu1 %1107 }
 0x127   : > { %v1145_v17 = vpop.f32.mrf.mxu2  ;;  %2145 = vmatmul.msk.bf16.gmra.mxu3 %vm859_vm6, %v2632_v21 }
 0x128   : > { %v1448_v18 = vshrl.u32 %v1356_v15, 16  ;;  %v1257_v20 = vmul.f32 %v2782_v60, %v1221_v16  ;;  %v1451_v25 = vshll.u32 %v1356_v15, 16 }
 0x129   : > { %v913_v12 = vpop.f32.mrf.mxu0 }
 0x12a   : > { %v1450_v23 = vrot.slane %v1448_v18, 7  ;;  %v1293_v4 = vadd.f32 %v2795_v63, %v1257_v20  ;;  %v2852_v21 = vpop.f32.mrf.mxu3 }
 0x12b   : > { %v1012_v30 = vpop.f32.mrf.mxu1 }
 0x12c   : > { %v1453_v34 = vor.u32 %v1451_v25, %v1450_v23  ;;  %v1325_v32 = vmax.f32 %v1293_v4, 0.0  ;;  %v1013_v35 = vadd.f32 %v1012_v30, %v913_v12  ;;  %2095 = vmatmul.msk.bf16.gmra.mxu0 %vm859_vm6, %v2738_v52  ;;  %v1454_v2 = vrot.slane %v1450_v23, 4  ;;  %v1113_v25 = vpop.permute.xlu2 %1112 }
 0x12d   : > { %v1115_v23 = vsel %vm752_vm4, %v2616_v62, %v1108_v14 }
 0x12e   : > { %v1772_v33 = vsel %vm2855_vm10, %v1453_v34, %v2148_v29  ;;  %v1357_v59 = vpack.c.bf16 %v1325_v32, %v1325_v32  ;;  %v1222_v36 = vadd.f32 %v1145_v17, %v1013_v35  ;;  %2115 = vmatmul.msk.bf16.gmra.mxu1 %vm859_vm6, %v2687_v50 }
 0x12f   : > { %2149 = vst [vmem:[%s2694_s13 + $0xc] sm:$0xf] %v1772_v33  ;;  %v1147_v39 = vpop.f32.mrf.mxu2  ;;  %v1117_v33 = vsel %vm785_vm5, %v1115_v23, %v1113_v25 }
 0x130   : > { %v1456_v40 = vshrl.u32 %v1357_v59, 16  ;;  %v1258_v41 = vmul.f32 %v2782_v60, %v1222_v36  ;;  %v1459_v10 = vshll.u32 %v1357_v59, 16 }
 0x131   : > { %v915_v42 = vpop.f32.mrf.mxu0 }
 0x132   : > { %v1458_v22 = vrot.slane %v1456_v40, 7  ;;  %v1294_v46 = vadd.f32 %v2795_v63, %v1258_v41  ;;  %v2895_v47 = vpop.f32.mrf.mxu3 }
 0x133   : > { %v1014_v38 = vpop.f32.mrf.mxu1 }
 0x134   : > { %v1461_v31 = vor.u32 %v1459_v10, %v1458_v22  ;;  %v1463_v49 = vrot.slane %v1458_v22, 4  ;;  %v1326_v50 = vmax.f32 %v1294_v46, 0.0  ;;  %v1015_v19 = vadd.f32 %v1014_v38, %v915_v42  ;;  %2142 = vmatmul.msk.bf16.gmra.mxu2 %vm859_vm6, %v2662_v43 }
 0x136   : > { %v1462_v51 = vsel %vm2887_vm13, %v1454_v2, %v1461_v31  ;;  %v1778_v28 = vsel %vm2899_vm14, %v1463_v49, %v2151_v37  ;;  %v1358_v57 = vpack.c.bf16 %v1326_v50, %v1326_v50  ;;  %v1223_v53 = vadd.f32 %v1147_v39, %v1015_v19  ;;  %v2158_v50 = vld [vmem:[%s2694_s13 + $0x24] sm:$0xf] }
 0x137   : > { %2150 = vst.msk [vmem:[%s2694_s13 + $0x10] sm:$0xf] %vm1388_vm7, %v1462_v51  ;;  %v1150_v56 = vpop.f32.mrf.mxu2  ;;  %2146 = vmatmul.msk.bf16.gmra.mxu3 %vm859_vm6, %v2646_v27  ;;  %v2153_v27 = vld [vmem:[%s2694_s13 + $0x18] sm:$0xf] }
 0x138   : > { %2152 = vst [vmem:[%s2694_s13 + $0x14] sm:$0x1] %v1778_v28  ;;  %v1465_v54 = vshrl.u32 %v1358_v57, 16  ;;  %v1259_v58 = vmul.f32 %v2782_v60, %v1223_v53  ;;  %v1468_v3 = vshll.u32 %v1358_v57, 16 }
 0x139   : > { %v918_v61 = vpop.f32.mrf.mxu0 }
 0x13a   : > { %v1467_v1 = vrot.slane %v1465_v54, 7  ;;  %v1295_v44 = vadd.f32 %v2795_v63, %v1259_v58  ;;  %v2935_v5 = vpop.f32.mrf.mxu3 }
 0x13b   : > { %v1017_v6 = vpop.f32.mrf.mxu1 }
 0x13c   : > { %v1470_v24 = vor.u32 %v1468_v3, %v1467_v1  ;;  %v1327_v9 = vmax.f32 %v1295_v44, 0.0  ;;  %v1018_v13 = vadd.f32 %v1017_v6, %v918_v61  ;;  %2096 = vmatmul.msk.bf16.gmra.mxu0 %vm859_vm6, %v2814_v7  ;;  %v1471_v32 = vrot.slane %v1467_v1, 4 }
 0x13e   : > { %v1781_v15 = vsel %vm2855_vm10, %v1470_v24, %v2153_v27  ;;  %v1359_v16 = vpack.c.bf16 %v1327_v9, %v1327_v9  ;;  %v1224_v17 = vadd.f32 %v1150_v56, %v1018_v13  ;;  %2116 = vmatmul.msk.bf16.gmra.mxu1 %vm859_vm6, %v2738_v52  ;;  %v2156_v52 = vld [vmem:[%s2694_s13 + $0x20] sm:$0x1]  ;;  %v2161_v9 = vld [vmem:[%s2694_s13 + $0x2c] sm:$0x1] }
 0x13f   : > { %2154 = vst [vmem:[%s2694_s13 + $0x18] sm:$0xf] %v1781_v15  ;;  %v1152_v18 = vpop.f32.mrf.mxu2 }
 0x140   : > { %v1473_v20 = vshrl.u32 %v1359_v16, 16  ;;  %v1260_v12 = vmul.f32 %v2782_v60, %v1224_v17  ;;  %v1476_v29 = vshll.u32 %v1359_v16, 16 }
 0x141   : > { %v920_v4 = vpop.f32.mrf.mxu0 }
 0x142   : > { %v1475_v11 = vrot.slane %v1473_v20, 7  ;;  %v1296_v30 = vadd.f32 %v2795_v63, %v1260_v12  ;;  %v2961_v34 = vpop.f32.mrf.mxu3 }
 0x143   : > { %v1019_v35 = vpop.f32.mrf.mxu1 }
 0x144   : > { %v1478_v59 = vor.u32 %v1476_v29, %v1475_v11  ;;  %v1480_v36 = vrot.slane %v1475_v11, 4  ;;  %v1328_v39 = vmax.f32 %v1296_v30, 0.0  ;;  %v1020_v40 = vadd.f32 %v1019_v35, %v920_v4  ;;  %2143 = vmatmul.msk.bf16.gmra.mxu2 %vm859_vm6, %v2586_v0  ;;  %v2163_v35 = vld [vmem:[%s2694_s13 + $0x30] sm:$0xf] }
 0x146   : > { %v1479_v62 = vsel %vm2887_vm13, %v1471_v32, %v1478_v59  ;;  %v1785_v41 = vsel %vm2899_vm14, %v1480_v36, %v2156_v52  ;;  %v1360_v42 = vpack.c.bf16 %v1328_v39, %v1328_v39  ;;  %v1225_v22 = vadd.f32 %v1152_v18, %v1020_v40 }
 0x147   : > { %2155 = vst.msk [vmem:[%s2694_s13 + $0x1c] sm:$0xf] %vm1388_vm7, %v1479_v62  ;;  %v1155_v10 = vpop.f32.mrf.mxu2  ;;  %2147 = vmatmul.msk.bf16.gmra.mxu3 %vm859_vm6, %v1117_v33 }
 0x148   : > { %2157 = vst [vmem:[%s2694_s13 + $0x20] sm:$0x1] %v1785_v41  ;;  %v1482_v46 = vshrl.u32 %v1360_v42, 16  ;;  %v1261_v2 = vmul.f32 %v2782_v60, %v1225_v22  ;;  %v1485_v38 = vshll.u32 %v1360_v42, 16 }
 0x149   : > { %v923_v0 = vpop.f32.mrf.mxu0 }
 0x14a   : > { %v1484_v37 = vrot.slane %v1482_v46, 7  ;;  %v1297_v31 = vadd.f32 %v2795_v63, %v1261_v2  ;;  %v2977_v49 = vpop.f32.mrf.mxu3 }
 0x14b   : > { %v1022_v19 = vpop.f32.mrf.mxu1 }
 0x14c   : > { %v1487_v51 = vor.u32 %v1485_v38, %v1484_v37  ;;  %v1329_v28 = vmax.f32 %v1297_v31, 0.0  ;;  %v1023_v57 = vadd.f32 %v1022_v19, %v923_v0  ;;  %2097 = vmatmul.msk.bf16.gmra.mxu0 %vm859_vm6, %v2662_v43  ;;  %v1488_v24 = vrot.slane %v1484_v37, 4 }
 0x14e   : > { %v1788_v53 = vsel %vm2855_vm10, %v1487_v51, %v2158_v50  ;;  %v1361_v56 = vpack.c.bf16 %v1329_v28, %v1329_v28  ;;  %v1226_v54 = vadd.f32 %v1155_v10, %v1023_v57  ;;  %2117 = vmatmul.msk.bf16.gmra.mxu1 %vm859_vm6, %v2814_v7  ;;  %v2166_v50 = vld [vmem:[%s2694_s13 + $0x38] sm:$0x1] }
 0x14f   : > { %2159 = vst [vmem:[%s2694_s13 + $0x24] sm:$0xf] %v1788_v53  ;;  %v1157_v58 = vpop.f32.mrf.mxu2 }
 0x150   : > { %v1490_v61 = vshrl.u32 %v1361_v56, 16  ;;  %v1262_v1 = vmul.f32 %v2782_v60, %v1226_v54  ;;  %v1493_v27 = vshll.u32 %v1361_v56, 16 }
 0x151   : > { %v925_v3 = vpop.f32.mrf.mxu0 }
 0x152   : > { %v1492_v44 = vrot.slane %v1490_v61, 7  ;;  %v1298_v43 = vadd.f32 %v2795_v63, %v1262_v1  ;;  %v2989_v6 = vpop.f32.mrf.mxu3 }
 0x153   : > { %v1024_v13 = vpop.f32.mrf.mxu1 }
 0x154   : > { %v1495_v14 = vor.u32 %v1493_v27, %v1492_v44  ;;  %v1497_v15 = vrot.slane %v1492_v44, 4  ;;  %v1330_v7 = vmax.f32 %v1298_v43, 0.0  ;;  %v1025_v16 = vadd.f32 %v1024_v13, %v925_v3 }
 0x156   : > { %v1496_v17 = vsel %vm2887_vm13, %v1488_v24, %v1495_v14  ;;  %v1792_v18 = vsel %vm2899_vm14, %v1497_v15, %v2161_v9  ;;  %v1362_v20 = vpack.c.bf16 %v1330_v7, %v1330_v7  ;;  %v1227_v12 = vadd.f32 %v1157_v58, %v1025_v16  ;;  %v2168_v14 = vld [vmem:[%s2694_s13 + $0x3c] sm:$0xf] }
 0x157   : > { %2160 = vst.msk [vmem:[%s2694_s13 + $0x28] sm:$0xf] %vm1388_vm7, %v1496_v17  ;;  %v1160_v23 = vpop.f32.mrf.mxu2 }
 0x158   : > { %2162 = vst [vmem:[%s2694_s13 + $0x2c] sm:$0x1] %v1792_v18  ;;  %v1499_v25 = vshrl.u32 %v1362_v20, 16  ;;  %v1263_v4 = vmul.f32 %v2782_v60, %v1227_v12  ;;  %v1502_v30 = vshll.u32 %v1362_v20, 16 }
 0x159   : > { %v928_v11 = vpop.f32.mrf.mxu0 }
 0x15a   : > { %v1501_v29 = vrot.slane %v1499_v25, 7  ;;  %v1299_v32 = vadd.f32 %v2795_v63, %v1263_v4  ;;  %v3001_v52 = vpop.f32.mrf.mxu3 }
 0x15b   : > { %v1027_v33 = vpop.f32.mrf.mxu1 }
 0x15c   : > { %v1504_v59 = vor.u32 %v1502_v30, %v1501_v29  ;;  %v1331_v36 = vmax.f32 %v1299_v32, 0.0  ;;  %v1028_v39 = vadd.f32 %v1027_v33, %v928_v11  ;;  %v1505_v31 = vrot.slane %v1501_v29, 4 }
 0x15e   : > { %v1795_v40 = vsel %vm2855_vm10, %v1504_v59, %v2163_v35  ;;  %v1363_v62 = vpack.c.bf16 %v1331_v36, %v1331_v36  ;;  %v1228_v41 = vadd.f32 %v1160_v23, %v1028_v39  ;;  %v2171_v59 = vld [vmem:[%s2694_s13 + $0x44] sm:$0x1] }
 0x15f   : > { %2164 = vst [vmem:[%s2694_s13 + $0x30] sm:$0xf] %v1795_v40  ;;  %v1162_v42 = vpop.f32.mrf.mxu2 }
 0x160   : > { %v1507_v22 = vshrl.u32 %v1363_v62, 16  ;;  %v1264_v10 = vmul.f32 %v2782_v60, %v1228_v41  ;;  %v1510_v0 = vshll.u32 %v1363_v62, 16 }
 0x161   : > { %v930_v46 = vpop.f32.mrf.mxu0 }
 0x162   : > { %v1509_v2 = vrot.slane %v1507_v22, 7  ;;  %v1300_v37 = vadd.f32 %v2795_v63, %v1264_v10  ;;  %v3009_v38 = vpop.f32.mrf.mxu3 }
 0x163   : > { %v1029_v19 = vpop.f32.mrf.mxu1 }
 0x164   : > { %v1512_v51 = vor.u32 %v1510_v0, %v1509_v2  ;;  %v1514_v28 = vrot.slane %v1509_v2, 4  ;;  %v1332_v57 = vmax.f32 %v1300_v37, 0.0  ;;  %v1030_v53 = vadd.f32 %v1029_v19, %v930_v46 }
 0x166   : > { %v1513_v56 = vsel %vm2887_vm13, %v1505_v31, %v1512_v51  ;;  %v1799_v54 = vsel %vm2899_vm14, %v1514_v28, %v2166_v50  ;;  %v1364_v58 = vpack.c.bf16 %v1332_v57, %v1332_v57  ;;  %v1229_v61 = vadd.f32 %v1162_v42, %v1030_v53  ;;  %v2173_v57 = vld [vmem:[%s2694_s13 + $0x48] sm:$0xf] }
 0x167   : > { %2165 = vst.msk [vmem:[%s2694_s13 + $0x34] sm:$0xf] %vm1388_vm7, %v1513_v56  ;;  %v1165_v1 = vpop.f32.mrf.mxu2 }
 0x168   : > { %2167 = vst [vmem:[%s2694_s13 + $0x38] sm:$0x1] %v1799_v54  ;;  %v1516_v3 = vshrl.u32 %v1364_v58, 16  ;;  %v1265_v44 = vmul.f32 %v2782_v60, %v1229_v61  ;;  %v1519_v24 = vshll.u32 %v1364_v58, 16 }
 0x169   : > { %v933_v27 = vpop.f32.mrf.mxu0 }
 0x16a   : > { %v1518_v43 = vrot.slane %v1516_v3, 7  ;;  %v1301_v9 = vadd.f32 %v2795_v63, %v1265_v44  ;;  %v3021_v13 = vpop.f32.mrf.mxu3 }
 0x16b   : > { %v1032_v15 = vpop.f32.mrf.mxu1 }
 0x16c   : > { %v1521_v7 = vor.u32 %v1519_v24, %v1518_v43  ;;  %v1333_v16 = vmax.f32 %v1301_v9, 0.0  ;;  %v1033_v17 = vadd.f32 %v1032_v15, %v933_v27  ;;  %v1522_v33 = vrot.slane %v1518_v43, 4 }
 0x16e   : > { %v1802_v18 = vsel %vm2855_vm10, %v1521_v7, %v2168_v14  ;;  %v1365_v20 = vpack.c.bf16 %v1333_v16, %v1333_v16  ;;  %v1230_v12 = vadd.f32 %v1165_v1, %v1033_v17  ;;  %v2176_v17 = vld [vmem:[%s2694_s13 + $0x50] sm:$0x1] }
 0x16f   : > { %2169 = vst [vmem:[%s2694_s13 + $0x3c] sm:$0xf] %v1802_v18  ;;  %v1167_v23 = vpop.f32.mrf.mxu2 }
 0x170   : > { %v1524_v25 = vshrl.u32 %v1365_v20, 16  ;;  %v1266_v4 = vmul.f32 %v2782_v60, %v1230_v12  ;;  %v1527_v30 = vshll.u32 %v1365_v20, 16 }
 0x171   : > { %v935_v11 = vpop.f32.mrf.mxu0 }
 0x172   : > { %v1526_v29 = vrot.slane %v1524_v25, 7  ;;  %v1302_v32 = vadd.f32 %v2795_v63, %v1266_v4  ;;  %v3029_v35 = vpop.f32.mrf.mxu3 }
 0x173   : > { %v1034_v36 = vpop.f32.mrf.mxu1 }
 0x174   : > { %v1529_v39 = vor.u32 %v1527_v30, %v1526_v29  ;;  %v1531_v40 = vrot.slane %v1526_v29, 4  ;;  %v1334_v62 = vmax.f32 %v1302_v32, 0.0  ;;  %v1035_v41 = vadd.f32 %v1034_v36, %v935_v11 }
 0x176   : > { %v1530_v42 = vsel %vm2887_vm13, %v1522_v33, %v1529_v39  ;;  %v1806_v22 = vsel %vm2899_vm14, %v1531_v40, %v2171_v59  ;;  %v1366_v10 = vpack.c.bf16 %v1334_v62, %v1334_v62  ;;  %v1231_v46 = vadd.f32 %v1167_v23, %v1035_v41 }
 0x177   : > { %2170 = vst.msk [vmem:[%s2694_s13 + $0x40] sm:$0xf] %vm1388_vm7, %v1530_v42  ;;  %v1170_v2 = vpop.f32.mrf.mxu2  ;;  %v2178_v42 = vld [vmem:[%s2694_s13 + $0x54] sm:$0xf] }
 0x178   : > { %2172 = vst [vmem:[%s2694_s13 + $0x44] sm:$0x1] %v1806_v22  ;;  %v1533_v0 = vshrl.u32 %v1366_v10, 16  ;;  %v1267_v37 = vmul.f32 %v2782_v60, %v1231_v46  ;;  %v1536_v19 = vshll.u32 %v1366_v10, 16 }
 0x179   : > { %v938_v31 = vpop.f32.mrf.mxu0 }
 0x17a   : > { %v1535_v50 = vrot.slane %v1533_v0, 7  ;;  %v1303_v51 = vadd.f32 %v2795_v63, %v1267_v37  ;;  %v3041_v28 = vpop.f32.mrf.mxu3 }
 0x17b   : > { %v1037_v53 = vpop.f32.mrf.mxu1 }
 0x17c   : > { %v1538_v56 = vor.u32 %v1536_v19, %v1535_v50  ;;  %v1335_v54 = vmax.f32 %v1303_v51, 0.0  ;;  %v1038_v58 = vadd.f32 %v1037_v53, %v938_v31  ;;  %v1539_v16 = vrot.slane %v1535_v50, 4 }
 0x17e   : > { %v1809_v61 = vsel %vm2855_vm10, %v1538_v56, %v2173_v57  ;;  %v1367_v1 = vpack.c.bf16 %v1335_v54, %v1335_v54  ;;  %v1232_v3 = vadd.f32 %v1170_v2, %v1038_v58 }
 0x17f   : > { %2174 = vst [vmem:[%s2694_s13 + $0x48] sm:$0xf] %v1809_v61  ;;  %v1172_v44 = vpop.f32.mrf.mxu2 }
 0x180   : > { %v1541_v27 = vshrl.u32 %v1367_v1, 16  ;;  %v1268_v43 = vmul.f32 %v2782_v60, %v1232_v3  ;;  %v1544_v14 = vshll.u32 %v1367_v1, 16  ;;  %v2181_v1 = vld [vmem:[%s2694_s13 + $0x5c] sm:$0x1] }
 0x181   : > { %v940_v24 = vpop.f32.mrf.mxu0 }
 0x182   : > { %v1543_v9 = vrot.slane %v1541_v27, 7  ;;  %v1304_v15 = vadd.f32 %v2795_v63, %v1268_v43  ;;  %v3049_v7 = vpop.f32.mrf.mxu3 }
 0x183   : > { %v1039_v18 = vpop.f32.mrf.mxu1 }
 0x184   : > { %v1546_v20 = vor.u32 %v1544_v14, %v1543_v9  ;;  %v1548_v12 = vrot.slane %v1543_v9, 4  ;;  %v1336_v23 = vmax.f32 %v1304_v15, 0.0  ;;  %v1040_v25 = vadd.f32 %v1039_v18, %v940_v24 }
 0x186   : > { %v1547_v4 = vsel %vm2887_vm13, %v1539_v16, %v1546_v20  ;;  %v1813_v11 = vsel %vm2899_vm14, %v1548_v12, %v2176_v17  ;;  %v1368_v29 = vpack.c.bf16 %v1336_v23, %v1336_v23  ;;  %v1233_v30 = vadd.f32 %v1172_v44, %v1040_v25 }
 0x187   : > { %2175 = vst.msk [vmem:[%s2694_s13 + $0x4c] sm:$0xf] %vm1388_vm7, %v1547_v4  ;;  %v1175_v32 = vpop.f32.mrf.mxu2  ;;  %v1068_v12 = vadd.f32 %v3001_v52, %v2771_v55 }
 0x188   : > { %2177 = vst [vmem:[%s2694_s13 + $0x50] sm:$0x1] %v1813_v11  ;;  %v1550_v33 = vshrl.u32 %v1368_v29, 16  ;;  %v1269_v59 = vmul.f32 %v2782_v60, %v1233_v30  ;;  %v1553_v40 = vshll.u32 %v1368_v29, 16  ;;  %v2183_v30 = vld [vmem:[%s2694_s13 + $0x60] sm:$0xf] }
 0x189   : > { %v943_v36 = vpop.f32.mrf.mxu0 }
 0x18a   : > { %v1552_v39 = vrot.slane %v1550_v33, 7  ;;  %v1305_v62 = vadd.f32 %v2795_v63, %v1269_v59  ;;  %v3061_v41 = vpop.f32.mrf.mxu3 }
 0x18b   : > { %v1042_v22 = vpop.f32.mrf.mxu1 }
 0x18c   : > { %v1555_v10 = vor.u32 %v1553_v40, %v1552_v39  ;;  %v1337_v46 = vmax.f32 %v1305_v62, 0.0  ;;  %v1043_v2 = vadd.f32 %v1042_v22, %v943_v36  ;;  %v1556_v61 = vrot.slane %v1552_v39, 4 }
 0x18e   : > { %v1816_v0 = vsel %vm2855_vm10, %v1555_v10, %v2178_v42  ;;  %v1369_v37 = vpack.c.bf16 %v1337_v46, %v1337_v46  ;;  %v1234_v31 = vadd.f32 %v1175_v32, %v1043_v2  ;;  %v1070_v2 = vadd.f32 %v3009_v38, %v2820_v8 }
 0x18f   : > { %2179 = vst [vmem:[%s2694_s13 + $0x54] sm:$0xf] %v1816_v0  ;;  %v1177_v50 = vpop.f32.mrf.mxu2 }
 0x190   : > { %v1558_v19 = vshrl.u32 %v1369_v37, 16  ;;  %v1270_v51 = vmul.f32 %v2782_v60, %v1234_v31  ;;  %v1561_v56 = vshll.u32 %v1369_v37, 16 }
 0x191   : > { %v945_v57 = vpop.f32.mrf.mxu0 }
 0x192   : > { %v1560_v53 = vrot.slane %v1558_v19, 7  ;;  %v1306_v54 = vadd.f32 %v2795_v63, %v1270_v51  ;;  %v3069_v58 = vpop.f32.mrf.mxu3 }
 0x193   : > { %v1044_v3 = vpop.f32.mrf.mxu1 }
 0x194   : > { %v1563_v44 = vor.u32 %v1561_v56, %v1560_v53  ;;  %v1565_v27 = vrot.slane %v1560_v53, 4  ;;  %v1338_v43 = vmax.f32 %v1306_v54, 0.0  ;;  %v1045_v24 = vadd.f32 %v1044_v3, %v945_v57  ;;  %v2186_v53 = vld [vmem:[%s2694_s13 + $0x68] sm:$0x1] }
 0x196   : > { %v1564_v9 = vsel %vm2887_vm13, %v1556_v61, %v1563_v44  ;;  %v1820_v14 = vsel %vm2899_vm14, %v1565_v27, %v2181_v1  ;;  %v1370_v15 = vpack.c.bf16 %v1338_v43, %v1338_v43  ;;  %v1235_v16 = vadd.f32 %v1177_v50, %v1045_v24 }
 0x197   : > { %2180 = vst.msk [vmem:[%s2694_s13 + $0x58] sm:$0xf] %vm1388_vm7, %v1564_v9  ;;  %v1180_v17 = vpop.f32.mrf.mxu2 }
 0x198   : > { %2182 = vst [vmem:[%s2694_s13 + $0x5c] sm:$0x1] %v1820_v14  ;;  %v1567_v18 = vshrl.u32 %v1370_v15, 16  ;;  %v1271_v20 = vmul.f32 %v2782_v60, %v1235_v16  ;;  %v1570_v4 = vshll.u32 %v1370_v15, 16 }
 0x199   : > { %v948_v23 = vpop.f32.mrf.mxu0 }
 0x19a   : > { %v1569_v25 = vrot.slane %v1567_v18, 7  ;;  %v1307_v11 = vadd.f32 %v2795_v63, %v1271_v20  ;;  %v1200_v29 = vpop.f32.mrf.mxu3  ;;  %v2208_v20 = vld [vmem:[%s2694_s13 + $0x9c] sm:$0xf] }
 0x19b   : > { %v1244_v32 = vadd.f32 %v1200_v29, %v1068_v12  ;;  %v1047_v33 = vpop.f32.mrf.mxu1 }
 0x19c   : > { %v1572_v59 = vor.u32 %v1570_v4, %v1569_v25  ;;  %v1339_v36 = vmax.f32 %v1307_v11, 0.0  ;;  %v1048_v39 = vadd.f32 %v1047_v33, %v948_v23  ;;  %v1573_v57 = vrot.slane %v1569_v25, 4 }
 0x19d   : > { %v1280_v40 = vmul.f32 %v2782_v60, %v1244_v32  ;;  %v1073_v25 = vadd.f32 %v3021_v13, %v2852_v21 }
 0x19e   : > { %v1823_v62 = vsel %vm2855_vm10, %v1572_v59, %v2183_v30  ;;  %v1371_v55 = vpack.c.bf16 %v1339_v36, %v1339_v36  ;;  %v1236_v52 = vadd.f32 %v1180_v17, %v1048_v39  ;;  %v2188_v39 = vld [vmem:[%s2694_s13 + $0x6c] sm:$0xf] }
 0x19f   : > { %2184 = vst [vmem:[%s2694_s13 + $0x60] sm:$0xf] %v1823_v62  ;;  %v1316_v42 = vadd.f32 %v2795_v63, %v1280_v40  ;;  %v1182_v22 = vpop.f32.mrf.mxu2 }
 0x1a0   : > { %v1575_v10 = vshrl.u32 %v1371_v55, 16  ;;  %v1272_v46 = vmul.f32 %v2782_v60, %v1236_v52  ;;  %v1578_v50 = vshll.u32 %v1371_v55, 16 }
 0x1a1   : > { %v1348_v0 = vmax.f32 %v1316_v42, 0.0  ;;  %v950_v37 = vpop.f32.mrf.mxu0 }
 0x1a2   : > { %v1577_v31 = vrot.slane %v1575_v10, 7  ;;  %v1308_v19 = vadd.f32 %v2795_v63, %v1272_v46  ;;  %v1202_v51 = vpop.f32.mrf.mxu3 }
 0x1a3   : > { %v1380_v56 = vpack.c.bf16 %v1348_v0, %v1348_v0  ;;  %v1245_v54 = vadd.f32 %v1202_v51, %v1070_v2  ;;  %v1049_v61 = vpop.f32.mrf.mxu1  ;;  %v2211_v51 = vld [vmem:[%s2694_s13 + $0xa4] sm:$0x1] }
 0x1a4   : > { %v1580_v1 = vor.u32 %v1578_v50, %v1577_v31  ;;  %v1582_v3 = vrot.slane %v1577_v31, 4  ;;  %v1340_v44 = vmax.f32 %v1308_v19, 0.0  ;;  %v1050_v27 = vadd.f32 %v1049_v61, %v950_v37 }
 0x1a5   : > { %v1652_v8 = vshrl.u32 %v1380_v56, 16  ;;  %v1281_v38 = vmul.f32 %v2782_v60, %v1245_v54  ;;  %v1655_v16 = vshll.u32 %v1380_v56, 16  ;;  %v1075_v19 = vadd.f32 %v3029_v35, %v2895_v47 }
 0x1a6   : > { %v1581_v43 = vsel %vm2887_vm13, %v1573_v57, %v1580_v1  ;;  %v1827_v24 = vsel %vm2899_vm14, %v1582_v3, %v2186_v53  ;;  %v1372_v9 = vpack.c.bf16 %v1340_v44, %v1340_v44  ;;  %v1237_v14 = vadd.f32 %v1182_v22, %v1050_v27 }
 0x1a7   : > { %2185 = vst.msk [vmem:[%s2694_s13 + $0x64] sm:$0xf] %vm1388_vm7, %v1581_v43  ;;  %v1654_v15 = vrot.slane %v1652_v8, 7  ;;  %v1317_v17 = vadd.f32 %v2795_v63, %v1281_v38  ;;  %v1185_v18 = vpop.f32.mrf.mxu2 }
 0x1a8   : > { %2187 = vst [vmem:[%s2694_s13 + $0x68] sm:$0x1] %v1827_v24  ;;  %v1584_v12 = vshrl.u32 %v1372_v9, 16  ;;  %v1273_v23 = vmul.f32 %v2782_v60, %v1237_v14  ;;  %v1587_v32 = vshll.u32 %v1372_v9, 16  ;;  %v2191_v24 = vld [vmem:[%s2694_s13 + $0x74] sm:$0x1] }
 0x1a9   : > { %v1657_v4 = vor.u32 %v1655_v16, %v1654_v15  ;;  %v1349_v11 = vmax.f32 %v1317_v17, 0.0  ;;  %v953_v29 = vpop.f32.mrf.mxu0  ;;  %v1658_v56 = vrot.slane %v1654_v15, 4 }
 0x1aa   : > { %v1586_v30 = vrot.slane %v1584_v12, 7  ;;  %v1309_v33 = vadd.f32 %v2795_v63, %v1273_v23  ;;  %v1205_v59 = vpop.f32.mrf.mxu3 }
 0x1ab   : > { %v1858_v36 = vsel %vm2855_vm10, %v1657_v4, %v2208_v20  ;;  %v1381_v40 = vpack.c.bf16 %v1349_v11, %v1349_v11  ;;  %v1246_v62 = vadd.f32 %v1205_v59, %v1073_v25  ;;  %v1052_v55 = vpop.f32.mrf.mxu1 }
 0x1ac   : > { %2209 = vst [vmem:[%s2694_s13 + $0x9c] sm:$0xf] %v1858_v36  ;;  %v1589_v52 = vor.u32 %v1587_v32, %v1586_v30  ;;  %v1341_v21 = vmax.f32 %v1309_v33, 0.0  ;;  %v1053_v13 = vadd.f32 %v1052_v55, %v953_v29  ;;  %v1590_v44 = vrot.slane %v1586_v30, 4  ;;  %v2213_v36 = vld [vmem:[%s2694_s13 + $0xa8] sm:$0xf] }
 0x1ad   : > { %v1660_v42 = vshrl.u32 %v1381_v40, 16  ;;  %v1282_v22 = vmul.f32 %v2782_v60, %v1246_v62  ;;  %v1663_v37 = vshll.u32 %v1381_v40, 16  ;;  %v1078_v62 = vadd.f32 %v3041_v28, %v2935_v5 }
 0x1ae   : > { %v1830_v10 = vsel %vm2855_vm10, %v1589_v52, %v2188_v39  ;;  %v1373_v46 = vpack.c.bf16 %v1341_v21, %v1341_v21  ;;  %v1238_v2 = vadd.f32 %v1185_v18, %v1053_v13 }
 0x1af   : > { %2189 = vst [vmem:[%s2694_s13 + $0x6c] sm:$0xf] %v1830_v10  ;;  %v1662_v0 = vrot.slane %v1660_v42, 7  ;;  %v1318_v31 = vadd.f32 %v2795_v63, %v1282_v22  ;;  %v1187_v50 = vpop.f32.mrf.mxu2 }
 0x1b0   : > { %v1592_v57 = vshrl.u32 %v1373_v46, 16  ;;  %v1274_v53 = vmul.f32 %v2782_v60, %v1238_v2  ;;  %v1595_v8 = vshll.u32 %v1373_v46, 16  ;;  %v2193_v2 = vld [vmem:[%s2694_s13 + $0x78] sm:$0xf] }
 0x1b1   : > { %v1665_v54 = vor.u32 %v1663_v37, %v1662_v0  ;;  %v1667_v61 = vrot.slane %v1662_v0, 4  ;;  %v1350_v1 = vmax.f32 %v1318_v31, 0.0  ;;  %v955_v3 = vpop.f32.mrf.mxu0 }
 0x1b2   : > { %v1594_v27 = vrot.slane %v1592_v57, 7  ;;  %v1310_v38 = vadd.f32 %v2795_v63, %v1274_v53  ;;  %v1207_v43 = vpop.f32.mrf.mxu3 }
 0x1b3   : > { %v1666_v47 = vsel %vm2887_vm13, %v1658_v56, %v1665_v54  ;;  %v1862_v35 = vsel %vm2899_vm14, %v1667_v61, %v2211_v51  ;;  %v1382_v9 = vpack.c.bf16 %v1350_v1, %v1350_v1  ;;  %v1247_v14 = vadd.f32 %v1207_v43, %v1075_v19  ;;  %v1054_v15 = vpop.f32.mrf.mxu1 }
 0x1b4   : > { %2210 = vst.msk [vmem:[%s2694_s13 + $0xa0] sm:$0xf] %vm1388_vm7, %v1666_v47  ;;  %v1597_v16 = vor.u32 %v1595_v8, %v1594_v27  ;;  %v1599_v17 = vrot.slane %v1594_v27, 4  ;;  %v1342_v18 = vmax.f32 %v1310_v38, 0.0  ;;  %v1055_v20 = vadd.f32 %v1054_v15, %v955_v3 }
 0x1b5   : > { %2212 = vst [vmem:[%s2694_s13 + $0xa4] sm:$0x1] %v1862_v35  ;;  %v1669_v12 = vshrl.u32 %v1382_v9, 16  ;;  %v1283_v23 = vmul.f32 %v2782_v60, %v1247_v14  ;;  %v1672_v32 = vshll.u32 %v1382_v9, 16  ;;  %v1080_v3 = vadd.f32 %v3049_v7, %v2961_v34  ;;  %v2196_v7 = vld [vmem:[%s2694_s13 + $0x80] sm:$0x1] }
 0x1b6   : > { %v1598_v25 = vsel %vm2887_vm13, %v1590_v44, %v1597_v16  ;;  %v1834_v4 = vsel %vm2899_vm14, %v1599_v17, %v2191_v24  ;;  %v1374_v11 = vpack.c.bf16 %v1342_v18, %v1342_v18  ;;  %v1239_v29 = vadd.f32 %v1187_v50, %v1055_v20  ;;  %v2216_v44 = vld [vmem:[%s2694_s13 + $0xb0] sm:$0x1] }
 0x1b7   : > { %2190 = vst.msk [vmem:[%s2694_s13 + $0x70] sm:$0xf] %vm1388_vm7, %v1598_v25  ;;  %v1671_v30 = vrot.slane %v1669_v12, 7  ;;  %v1319_v33 = vadd.f32 %v2795_v63, %v1283_v23  ;;  %v1190_v59 = vpop.f32.mrf.mxu2 }
 0x1b8   : > { %2192 = vst [vmem:[%s2694_s13 + $0x74] sm:$0x1] %v1834_v4  ;;  %v1601_v39 = vshrl.u32 %v1374_v11, 16  ;;  %v1275_v40 = vmul.f32 %v2782_v60, %v1239_v29  ;;  %v1604_v42 = vshll.u32 %v1374_v11, 16 }
 0x1b9   : > { %v1674_v55 = vor.u32 %v1672_v32, %v1671_v30  ;;  %v1351_v52 = vmax.f32 %v1319_v33, 0.0  ;;  %v958_v21 = vpop.f32.mrf.mxu0  ;;  %v1675_v38 = vrot.slane %v1671_v30, 4  ;;  %v3169_v30 = vld [vmem:[%s3258_s2] ss:$0 sm:$0xff] }
 0x1ba   : > { %v1603_v13 = vrot.slane %v1601_v39, 7  ;;  %v1311_v22 = vadd.f32 %v2795_v63, %v1275_v40  ;;  %v1210_v10 = vpop.f32.mrf.mxu3 }
 0x1bb   : > { %v1865_v46 = vsel %vm2855_vm10, %v1674_v55, %v2213_v36  ;;  %v1383_v0 = vpack.c.bf16 %v1351_v52, %v1351_v52  ;;  %v1248_v37 = vadd.f32 %v1210_v10, %v1078_v62  ;;  %v1057_v31 = vpop.f32.mrf.mxu1  ;;  %v3181_v55 = vld [vmem:[%s3259_s3] ss:$0 sm:$0xff] }
 0x1bc   : > { %2214 = vst [vmem:[%s2694_s13 + $0xa8] sm:$0xf] %v1865_v46  ;;  %v1606_v50 = vor.u32 %v1604_v42, %v1603_v13  ;;  %v1343_v5 = vmax.f32 %v1311_v22, 0.0  ;;  %v1058_v28 = vadd.f32 %v1057_v31, %v958_v21  ;;  %v1607_v14 = vrot.slane %v1603_v13, 4  ;;  %v2218_v21 = vld [vmem:[%s2694_s13 + $0xb4] sm:$0xf] }
 0x1bd   : > { %v1677_v19 = vshrl.u32 %v1383_v0, 16  ;;  %v1284_v51 = vmul.f32 %v2782_v60, %v1248_v37  ;;  %v1680_v61 = vshll.u32 %v1383_v0, 16  ;;  %v1083_v22 = vadd.f32 %v3061_v41, %v2977_v49 }
 0x1be   : > { %v1837_v57 = vsel %vm2855_vm10, %v1606_v50, %v2193_v2  ;;  %v1375_v53 = vpack.c.bf16 %v1343_v5, %v1343_v5  ;;  %v1240_v56 = vadd.f32 %v1190_v59, %v1058_v28  ;;  %v2198_v28 = vld [vmem:[%s2694_s13 + $0x84] sm:$0xf] }
 0x1bf   : > { %2194 = vst [vmem:[%s2694_s13 + $0x78] sm:$0xf] %v1837_v57  ;;  %v1679_v54 = vrot.slane %v1677_v19, 7  ;;  %v1320_v1 = vadd.f32 %v2795_v63, %v1284_v51  ;;  %v1192_v24 = vpop.f32.mrf.mxu2 }
 0x1c0   : > { %v1609_v27 = vshrl.u32 %v1375_v53, 16  ;;  %v1276_v8 = vmul.f32 %v2782_v60, %v1240_v56  ;;  %v1612_v16 = vshll.u32 %v1375_v53, 16 }
 0x1c1   : > { %v1682_v43 = vor.u32 %v1680_v61, %v1679_v54  ;;  %v1684_v47 = vrot.slane %v1679_v54, 4  ;;  %v1352_v35 = vmax.f32 %v1320_v1, 0.0  ;;  %v960_v9 = vpop.f32.mrf.mxu0 }
 0x1c2   : > { %v1611_v15 = vrot.slane %v1609_v27, 7  ;;  %v1312_v17 = vadd.f32 %v2795_v63, %v1276_v8  ;;  %v1212_v18 = vpop.f32.mrf.mxu3 }
 0x1c3   : > { %v1683_v34 = vsel %vm2887_vm13, %v1675_v38, %v1682_v43  ;;  %v1869_v60 = vsel %vm2899_vm14, %v1684_v47, %v2216_v44  ;;  %v1384_v20 = vpack.c.bf16 %v1352_v35, %v1352_v35  ;;  %v1249_v12 = vadd.f32 %v1212_v18, %v1080_v3  ;;  %v1059_v23 = vpop.f32.mrf.mxu1  ;;  %v2221_v47 = vld [vmem:[%s2694_s13 + $0xbc] sm:$0x1] }
 0x1c4   : > { %2215 = vst.msk [vmem:[%s2694_s13 + $0xac] sm:$0xf] %vm1388_vm7, %v1683_v34  ;;  %v1614_v25 = vor.u32 %v1612_v16, %v1611_v15  ;;  %v1616_v4 = vrot.slane %v1611_v15, 4  ;;  %v1344_v11 = vmax.f32 %v1312_v17, 0.0  ;;  %v1060_v63 = vadd.f32 %v1059_v23, %v960_v9 }
 0x1c5   : > { %2217 = vst [vmem:[%s2694_s13 + $0xb0] sm:$0x1] %v1869_v60  ;;  %v1686_v29 = vshrl.u32 %v1384_v20, 16  ;;  %v1285_v32 = vmul.f32 %v3169_v30, %v1249_v12  ;;  %v1689_v62 = vshll.u32 %v1384_v20, 16  ;;  %v1085_v43 = vadd.f32 %v3069_v58, %v2989_v6  ;;  %v2201_v58 = vld [vmem:[%s2694_s13 + $0x8c] sm:$0x1] }
 0x1c6   : > { %v1615_v33 = vsel %vm2887_vm13, %v1607_v14, %v1614_v25  ;;  %v1841_v59 = vsel %vm2899_vm14, %v1616_v4, %v2196_v7  ;;  %v1376_v36 = vpack.c.bf16 %v1344_v11, %v1344_v11  ;;  %v1241_v39 = vadd.f32 %v1192_v24, %v1060_v63 }
 0x1c7   : > { %2195 = vst.msk [vmem:[%s2694_s13 + $0x7c] sm:$0xf] %vm1388_vm7, %v1615_v33  ;;  %v1688_v40 = vrot.slane %v1686_v29, 7  ;;  %v1321_v52 = vadd.f32 %v3181_v55, %v1285_v32  ;;  %v1195_v51 = vpop.f32.mrf.mxu2 }
 0x1c8   : > { %2197 = vst [vmem:[%s2694_s13 + $0x80] sm:$0x1] %v1841_v59  ;;  %v1618_v13 = vshrl.u32 %v1376_v36, 16  ;;  %v1277_v42 = vmul.f32 %v3169_v30, %v1241_v39  ;;  %v1621_v37 = vshll.u32 %v1376_v36, 16 }
 0x1c9   : > { %v1691_v10 = vor.u32 %v1689_v62, %v1688_v40  ;;  %v1353_v46 = vmax.f32 %v1321_v52, 0.0  ;;  %v963_v2 = vpop.f32.mrf.mxu0  ;;  %v1692_v9 = vrot.slane %v1688_v40, 4 }
 0x1ca   : > { %v1620_v0 = vrot.slane %v1618_v13, 7  ;;  %v1313_v31 = vadd.f32 %v3181_v55, %v1277_v42  ;;  %v1215_v50 = vpop.f32.mrf.mxu3 }
 0x1cb   : > { %v1872_v5 = vsel %vm2855_vm10, %v1691_v10, %v2218_v21  ;;  %v1385_v19 = vpack.c.bf16 %v1353_v46, %v1353_v46  ;;  %v1250_v57 = vadd.f32 %v1215_v50, %v1083_v22  ;;  %v1062_v53 = vpop.f32.mrf.mxu1  ;;  %v2223_v22 = vld [vmem:[%s2694_s13 + $0xc0] sm:$0xf] }
 0x1cc   : > { %2219 = vst [vmem:[%s2694_s13 + $0xb4] sm:$0xf] %v1872_v5  ;;  %v1623_v49 = vor.u32 %v1621_v37, %v1620_v0  ;;  %v1345_v41 = vmax.f32 %v1313_v31, 0.0  ;;  %v1063_v56 = vadd.f32 %v1062_v53, %v963_v2  ;;  %v1624_v17 = vrot.slane %v1620_v0, 4 }
 0x1cd   : > { %v1694_v54 = vshrl.u32 %v1385_v19, 16  ;;  %v1286_v61 = vmul.f32 %v3169_v30, %v1250_v57  ;;  %v1697_v8 = vshll.u32 %v1385_v19, 16 }
 0x1ce   : > { %v1844_v1 = vsel %vm2855_vm10, %v1623_v49, %v2198_v28  ;;  %v1377_v3 = vpack.c.bf16 %v1345_v41, %v1345_v41  ;;  %v1242_v44 = vadd.f32 %v1195_v51, %v1063_v56  ;;  %v2203_v28 = vld [vmem:[%s2694_s13 + $0x90] sm:$0xf] }
 0x1cf   : > { %2199 = vst [vmem:[%s2694_s13 + $0x84] sm:$0xf] %v1844_v1  ;;  %v1696_v27 = vrot.slane %v1694_v54, 7  ;;  %v1322_v38 = vadd.f32 %v3181_v55, %v1286_v61  ;;  %v1197_v59 = vpop.f32.mrf.mxu2 }
 0x1d0   : > { %v1626_v35 = vshrl.u32 %v1377_v3, 16  ;;  %v1278_v24 = vmul.f32 %v3169_v30, %v1242_v44  ;;  %v1629_v34 = vshll.u32 %v1377_v3, 16 }
 0x1d1   : > { %v1699_v14 = vor.u32 %v1697_v8, %v1696_v27  ;;  %v1701_v15 = vrot.slane %v1696_v27, 4  ;;  %v1354_v16 = vmax.f32 %v1322_v38, 0.0  ;;  %v965_v23 = vpop.f32.mrf.mxu0  ;;  %v2206_v38 = vld [vmem:[%s2694_s13 + $0x98] sm:$0x1] }
 0x1d2   : > { %v1628_v18 = vrot.slane %v1626_v35, 7  ;;  %v1314_v60 = vadd.f32 %v3181_v55, %v1278_v24  ;;  %v1217_v7 = vpop.f32.mrf.mxu3 }
 0x1d3   : > { %v1700_v20 = vsel %vm2887_vm13, %v1692_v9, %v1699_v14  ;;  %v1876_v6 = vsel %vm2899_vm14, %v1701_v15, %v2221_v47  ;;  %v1386_v12 = vpack.c.bf16 %v1354_v16, %v1354_v16  ;;  %v1251_v25 = vadd.f32 %v1217_v7, %v1085_v43  ;;  %v1064_v4 = vpop.f32.mrf.mxu1 }
 0x1d4   : > { %2220 = vst.msk [vmem:[%s2694_s13 + $0xb8] sm:$0xf] %vm1388_vm7, %v1700_v20  ;;  %v1631_v11 = vor.u32 %v1629_v34, %v1628_v18  ;;  %v1633_v63 = vrot.slane %v1628_v18, 4  ;;  %v1346_v29 = vmax.f32 %v1314_v60, 0.0  ;;  %v1065_v32 = vadd.f32 %v1064_v4, %v965_v23 }
 0x1d5   : > { %2222 = vst [vmem:[%s2694_s13 + $0xbc] sm:$0x1] %v1876_v6  ;;  %v1703_v33 = vshrl.u32 %v1386_v12, 16  ;;  %v1287_v36 = vmul.f32 %v3169_v30, %v1251_v25  ;;  %v1706_v13 = vshll.u32 %v1386_v12, 16 }
 0x1d6   : > { %v1632_v39 = vsel %vm2887_vm13, %v1624_v17, %v1631_v11  ;;  %v1848_v40 = vsel %vm2899_vm14, %v1633_v63, %v2201_v58  ;;  %v1378_v62 = vpack.c.bf16 %v1346_v29, %v1346_v29  ;;  %v1243_v52 = vadd.f32 %v1197_v59, %v1065_v32 }
 0x1d7   : > { %2200 = vst.msk [vmem:[%s2694_s13 + $0x88] sm:$0xf] %vm1388_vm7, %v1632_v39  ;;  %v1705_v21 = vrot.slane %v1703_v33, 7  ;;  %v1323_v42 = vadd.f32 %v3181_v55, %v1287_v36 }
 0x1d8   : > { %2202 = vst [vmem:[%s2694_s13 + $0x8c] sm:$0x1] %v1848_v40  ;;  %v1635_v10 = vshrl.u32 %v1378_v62, 16  ;;  %v1279_v46 = vmul.f32 %v3169_v30, %v1243_v52  ;;  %v1638_v31 = vshll.u32 %v1378_v62, 16 }
 0x1d9   : > { %v1708_v2 = vor.u32 %v1706_v13, %v1705_v21  ;;  %v1355_v0 = vmax.f32 %v1323_v42, 0.0  ;;  %v1709_v61 = vrot.slane %v1705_v21, 4 }
 0x1da   : > { %v1637_v37 = vrot.slane %v1635_v10, 7  ;;  %v1315_v50 = vadd.f32 %v3181_v55, %v1279_v46  ;;  %v2226_v55 = vld [vmem:[%s2694_s13 + $0xc8] sm:$0x1] }
 0x1db   : > { %v1879_v5 = vsel %vm2855_vm10, %v1708_v2, %v2223_v22  ;;  %v1387_v19 = vpack.c.bf16 %v1355_v0, %v1355_v0 }
 0x1dc   : > { %2224 = vst [vmem:[%s2694_s13 + $0xc0] sm:$0xf] %v1879_v5  ;;  %v1640_v51 = vor.u32 %v1638_v31, %v1637_v37  ;;  %v1347_v57 = vmax.f32 %v1315_v50, 0.0  ;;  %v1641_v43 = vrot.slane %v1637_v37, 4 }
 0x1dd   : > { %v1711_v53 = vshrl.u32 %v1387_v19, 16  ;;  %v1714_v56 = vshll.u32 %v1387_v19, 16 }
 0x1de   : > { %v1851_v30 = vsel %vm2855_vm10, %v1640_v51, %v2203_v28  ;;  %v1379_v49 = vpack.c.bf16 %v1347_v57, %v1347_v57 }
 0x1df   : > { %2204 = vst [vmem:[%s2694_s13 + $0x90] sm:$0xf] %v1851_v30  ;;  %v1713_v41 = vrot.slane %v1711_v53, 7 }
 0x1e0   : > { %v1643_v54 = vshrl.u32 %v1379_v49, 16  ;;  %v1646_v27 = vshll.u32 %v1379_v49, 16 }
 0x1e1   : > { %v1716_v1 = vor.u32 %v1714_v56, %v1713_v41  ;;  %v1718_v3 = vrot.slane %v1713_v41, 4 }
 0x1e2   : > { %v1645_v44 = vrot.slane %v1643_v54, 7 }
 0x1e3   : > { %v1717_v8 = vsel %vm2887_vm13, %v1709_v61, %v1716_v1  ;;  %v1883_v26 = vsel %vm2899_vm14, %v1718_v3, %v2226_v55 }
 0x1e4   : > { %2225 = vst.msk [vmem:[%s2694_s13 + $0xc4] sm:$0xf] %vm1388_vm7, %v1717_v8  ;;  %v1648_v47 = vor.u32 %v1646_v27, %v1645_v44  ;;  %v1650_v35 = vrot.slane %v1645_v44, 4 }
 0x1e5   : > { %2227 = vst [vmem:[%s2694_s13 + $0xc8] sm:$0x1] %v1883_v26 }
 0x1e6   : > { %v1649_v24 = vsel %vm2887_vm13, %v1641_v43, %v1648_v47  ;;  %v1855_v9 = vsel %vm2899_vm14, %v1650_v35, %v2206_v38 }
 0x1e7   : > { %2205 = vst.msk [vmem:[%s2694_s13 + $0x94] sm:$0xf] %vm1388_vm7, %v1649_v24 }
 0x1e8   : > { %2207 = vst [vmem:[%s2694_s13 + $0x98] sm:$0x1] %v1855_v9 }
 0x1e9 PF: > { %s14_s17 = sadd.s32 1, %s2309_s17   ;;  %s3267_s15 = smov %s2305_s16 }
 0x1ea   : > { %p11_p5 = scmp.ge.s32.totalorder %s14_s17, 4   ;;  %s3268_s16 = smov %s3270_s18 }
 0x1ec   :  { %13 = sbr.rel (!%p11_p5) target bundleno = 2 (0x2), region = 78 }

</bundles_post_ra>
